<compile_context>
chip_gen: v7x
topology: tpu7x:2x2x1
jax: 0.10.0
libtpu: 0.0.40
codegen_flags: <defaults>
</compile_context>

<pallas_src>
import functools

import jax
import jax.numpy as jnp
from jax.experimental import pallas as pl
from jax.experimental.pallas import tpu as pltpu

EPS = 1e-5  # BatchNorm2d default eps


def _net_kernel(xq_ref, wbd_ref, wl_ref, const_ref, out_ref, canvas_ref, *,
                n, cin, cout, npos, out_classes):
    # xq_ref:    (4, (npos+1)*n, (npos+1)*cin)  parity-split padded input
    # wbd_ref:   (9*npos*cin, npos*cout)        block-diagonal conv weights (9 taps)
    # wl_ref:    (npos*npos*cout, out_classes)  linear weight in (ho, wo, c) row order
    # const_ref: ((npos-1)*cout + 3, (npos-1)*cout) packed P / gamma / beta / lin_b
    # out_ref:   (n, out_classes)
    # canvas_ref:(npos*n, npos*cout)            maxpool canvas scratch
    kc = npos * cin                 # operand cols   (window col j, input channel)
    oc = npos * cout                # conv/canvas cols (window col j, output channel)
    nrows = npos * n                # rows = (window row i, batch n) interleaved
    vrows = (npos - 1) * n          # valid (non pool-pad) rows
    vcols = (npos - 1) * cout       # valid (non pool-pad) cols
    inv_cnt = 1.0 / float(n * (2 * (npos - 1)) ** 2)   # 1 / (N*H*W)

    # ---- Conv2d: 4 parity classes x 9 taps of accumulated MXU matmuls ------------
    classes = []
    sum_v = None
    sumsq_v = None
    for ey in (0, 1):
        for ex in (0, 1):
            acc = None
            for dy in range(3):
                for dx in range(3):
                    sy, py = divmod(ey + dy, 2)
                    sx, px = divmod(ex + dx, 2)
                    a = xq_ref[py * 2 + px,
                               sy * n: sy * n + nrows,
                               sx * cin: sx * cin + kc]           # (18, 36)
                    k = dy * 3 + dx
                    w = wbd_ref[k * kc:(k + 1) * kc, :]           # (36, 36)
                    t = jnp.dot(a, w, preferred_element_type=jnp.float32)
                    acc = t if acc is None else acc + t
            # Valid sub-block: drop window elements that fall on pooling padding
            # (conv pixel h or w in {-1, H}); every real conv pixel appears exactly
            # once across the 4 classes, so BN stats over these slices are exact.
            r0 = (1 - ey) * n
            c0 = (1 - ex) * cout
            v = acc[r0:r0 + vrows, c0:c0 + vcols]                 # (16, 32)
            classes.append((v, r0, c0))
            sum_v = v if sum_v is None else sum_v + v
            sumsq_v = v * v if sumsq_v is None else sumsq_v + v * v

    # ---- training-mode BatchNorm: one-pass stats folded into a single FMA --------
    p_fold = const_ref[0:vcols, 0:vcols]                          # per-channel fold+bcast
    gamma = const_ref[vcols:vcols + 1, 0:vcols]                   # (1, 32) tiled gamma
    beta = const_ref[vcols + 1:vcols + 2, 0:vcols]                # (1, 32) tiled beta
    lin_b = const_ref[vcols + 2:vcols + 3, 0:out_classes]         # (1, out)

    s32 = jnp.sum(sum_v, axis=0, keepdims=True)                   # (1, 32)
    q32 = jnp.sum(sumsq_v, axis=0, keepdims=True)                 # (1, 32)
    mean = jnp.dot(s32, p_fold, preferred_element_type=jnp.float32) * inv_cnt
    ex2 = jnp.dot(q32, p_fold, preferred_element_type=jnp.float32) * inv_cnt
    var = ex2 - mean * mean                                       # biased variance
    scale = gamma * jax.lax.rsqrt(var + EPS)
    shift = beta - mean * scale

    # ---- BN + ReLU + MaxPool2d(2,2,pad=1): aligned max of the 4 classes ----------
    canvas_ref[...] = jnp.zeros_like(canvas_ref)                  # ReLU => 0 is identity
    for v, r0, c0 in classes:
        y = jnp.maximum(v * scale + shift, 0.0)                   # (16, 32)
        cur = canvas_ref[r0:r0 + vrows, c0:c0 + vcols]
        canvas_ref[r0:r0 + vrows, c0:c0 + vcols] = jnp.maximum(cur, y)

    # ---- Linear(324, out) + Softmax / ReLU ---------------------------------------
    logits = None
    for i in range(npos):
        row = canvas_ref[i * n:(i + 1) * n, :]                    # (n, 36)
        w_i = wl_ref[i * oc:(i + 1) * oc, :]                      # (36, out)
        t = jnp.dot(row, w_i, preferred_element_type=jnp.float32)
        logits = t if logits is None else logits + t
    logits = logits + lin_b
    if out_classes == 1:                                          # ReLU head
        out_ref[...] = jnp.maximum(logits, 0.0)
    else:                                                         # Softmax(dim=1)
        m = jnp.max(logits, axis=-1, keepdims=True)
        e = jnp.exp(logits - m)
        out_ref[...] = e / jnp.sum(e, axis=-1, keepdims=True)


def prepare_params(params, output_classes, npos=9):
    """One-time repack of PyTorch-style parameters into the kernel layout."""
    w = params["conv_w"].astype(jnp.float32)                      # (cout, cin, 3, 3)
    cout, cin = int(w.shape[0]), int(w.shape[1])
    eye = jnp.eye(npos, dtype=jnp.float32)
    blocks = [jnp.kron(eye, w[:, :, dy, dx].T)                    # (npos*cin, npos*cout)
              for dy in range(3) for dx in range(3)]
    wbd = jnp.concatenate(blocks, axis=0)                         # (9*npos*cin, npos*cout)

    # Linear weight: PyTorch (out, C*Hp*Wp) with (C,Hp,Wp) flatten -> kernel rows in
    # (Hp, Wp, C) order.  (Real PyTorch-trained weights must go through this permute.)
    wl = params["lin_w"].astype(jnp.float32).reshape(output_classes, cout, npos, npos)
    wl = jnp.transpose(wl, (2, 3, 1, 0)).reshape(npos * npos * cout, output_classes)

    # Packed small constants: P (per-channel stat fold + broadcast), gamma, beta, bias.
    vcols = (npos - 1) * cout
    consts = jnp.zeros((vcols + 3, vcols), jnp.float32)
    consts = consts.at[0:vcols, :].set(
        jnp.tile(jnp.eye(cout, dtype=jnp.float32), (npos - 1, npos - 1)))
    consts = consts.at[vcols, :].set(
        jnp.tile(params["bn_gamma"].astype(jnp.float32), npos - 1))
    consts = consts.at[vcols + 1, :].set(
        jnp.tile(params["bn_beta"].astype(jnp.float32), npos - 1))
    consts = consts.at[vcols + 2, 0:output_classes].set(params["lin_b"].astype(jnp.float32))
    # NOTE: conv_b is intentionally unused -- training-mode BatchNorm's mean
    # subtraction cancels a per-channel conv bias exactly (redundant work removed).
    return {"wbd": wbd, "wl": wl, "consts": consts}


@functools.partial(jax.jit, static_argnames=("output_classes",))
def net_forward(x_nchw, kparams, output_classes):
    n, cin, h, w = x_nchw.shape
    cout = 4
    npos = h // 2 + 1                                             # pooled grid size (9)

    # --- tiny JAX glue: NCHW->NHWC, zero-pad by 2, parity-split (all ~13 KB) -------
    x = jnp.transpose(x_nchw, (0, 2, 3, 1)).astype(jnp.float32)
    xp = jnp.pad(x, ((0, 0), (2, 2), (2, 2), (0, 0)))             # (n, h+4, w+4, cin)
    qs = []
    for py in (0, 1):
        for px in (0, 1):
            t = xp[:, py::2, px::2, :]                            # (n, npos+1, npos+1, cin)
            t = jnp.transpose(t, (1, 0, 2, 3)).reshape((npos + 1) * n, (npos + 1) * cin)
            qs.append(t)
    xq = jnp.stack(qs, axis=0)                                    # (4, 20, 40)

    wbd, wl, consts = kparams["wbd"], kparams["wl"], kparams["consts"]
    kernel = functools.partial(_net_kernel, n=n, cin=cin, cout=cout, npos=npos,
                               out_classes=output_classes)
    return pl.pallas_call(
        kernel,
        out_shape=jax.ShapeDtypeStruct((n, output_classes), jnp.float32),
        grid=(1,),
        in_specs=[
            pl.BlockSpec(xq.shape, lambda i: (0, 0, 0)),
            pl.BlockSpec(wbd.shape, lambda i: (0, 0)),
            pl.BlockSpec(wl.shape, lambda i: (0, 0)),
            pl.BlockSpec(consts.shape, lambda i: (0, 0)),
        ],
        out_specs=pl.BlockSpec((n, output_classes), lambda i: (0, 0)),
        scratch_shapes=[pltpu.VMEM((npos * n, npos * cout), jnp.float32)],
        compiler_params=pltpu.CompilerParams(dimension_semantics=("arbitrary",)),
    )(xq, wbd, wl, consts)


def reference_forward(x_nchw, params, output_classes):
    """Pure-JAX reference of the PyTorch module (training-mode BN, incl. conv bias)."""
    hp = jax.lax.Precision.HIGHEST
    conv = jax.lax.conv_general_dilated(
        x_nchw.astype(jnp.float32), params["conv_w"].astype(jnp.float32),
        window_strides=(1, 1), padding=((1, 1), (1, 1)),
        dimension_numbers=("NCHW", "OIHW", "NCHW"), precision=hp)
    conv = conv + params["conv_b"][None, :, None, None]
    mean = jnp.mean(conv, axis=(0, 2, 3), keepdims=True)
    var = jnp.var(conv, axis=(0, 2, 3), keepdims=True)            # biased
    y = (conv - mean) * jax.lax.rsqrt(var + EPS)
    y = params["bn_gamma"][None, :, None, None] * y + params["bn_beta"][None, :, None, None]
    y = jnp.maximum(y, 0.0)
    yp = jnp.pad(y, ((0, 0), (0, 0), (1, 1), (1, 1)), constant_values=-jnp.inf)
    pooled = jnp.maximum(
        jnp.maximum(yp[:, :, 0::2, 0::2], yp[:, :, 0::2, 1::2]),
        jnp.maximum(yp[:, :, 1::2, 0::2], yp[:, :, 1::2, 1::2]))  # (n, c, 9, 9)
    flat = pooled.reshape(x_nchw.shape[0], -1)                    # PyTorch (C,Hp,Wp) flatten
    logits = jnp.dot(flat, params["lin_w"].T, precision=hp) + params["lin_b"]
    if output_classes == 1:
        return jnp.maximum(logits, 0.0)
    return jax.nn.softmax(logits, axis=-1)


if __name__ == "__main__":
    N, C, H, W = 2, 4, 16, 16          # batch=2, nrattribs=4, model_shape=(4,16,16)
    OUT_CLASSES = 3                    # > 1  ->  Softmax head
    COUT = 4
    HP = H // 2 + 1
    F = COUT * HP * HP                 # 324 == after_cnn_size

    key = jax.random.PRNGKey(0)
    k1, k2, k3, k4, kx = jax.random.split(key, 5)
    fan_conv = 9.0 * C
    params = {
        "conv_w": jax.random.uniform(k1, (COUT, C, 3, 3), jnp.float32, -1.0, 1.0)
                  / jnp.sqrt(fan_conv),
        "conv_b": jax.random.uniform(k2, (COUT,), jnp.float32, -1.0, 1.0)
                  / jnp.sqrt(fan_conv),
        "bn_gamma": jnp.ones((COUT,), jnp.float32),   # BatchNorm2d default init
        "bn_beta": jnp.zeros((COUT,), jnp.float32),
        # PyTorch Linear layout: (out_features, in_features), input flattened (C,Hp,Wp)
        "lin_w": jax.random.uniform(k3, (OUT_CLASSES, F), jnp.float32, -1.0, 1.0)
                 / jnp.sqrt(float(F)),
        "lin_b": jax.random.uniform(k4, (OUT_CLASSES,), jnp.float32, -1.0, 1.0)
                 / jnp.sqrt(float(F)),
    }
    # TODO(synk): training-mode BatchNorm running-stat updates are module state
    # mutation, not part of the forward output, and are not modeled here.

    x = jax.random.normal(kx, (N, C, H, W), jnp.float32)   # NCHW like PyTorch

    kparams = prepare_params(params, OUT_CLASSES)
    out = jax.block_until_ready(net_forward(x, kparams, output_classes=OUT_CLASSES))
    ref = jax.block_until_ready(reference_forward(x, params, OUT_CLASSES))

    assert out.shape == (N, OUT_CLASSES)
    assert bool(jnp.all(jnp.isfinite(out)))
    assert bool(jnp.allclose(jnp.sum(out, axis=-1), 1.0, atol=1e-5))
    assert bool(jnp.allclose(out, ref, atol=2e-2, rtol=2e-2)), (out, ref)
    print("KERNEL_OK")
</pallas_src>

<mosaic_0001>
module attributes {stable_mosaic.version = 11 : i64} {
  func.func @_net_kernel(%arg0: i32, %arg1: memref<4x20x40xf32, #tpu.memory_space<vmem>>, %arg2: memref<324x36xf32, #tpu.memory_space<vmem>>, %arg3: memref<324x3xf32, #tpu.memory_space<vmem>>, %arg4: memref<35x32xf32, #tpu.memory_space<vmem>>, %arg5: memref<2x3xf32, #tpu.memory_space<vmem>>, %arg6: memref<18x36xf32, #tpu.memory_space<vmem>>) attributes {dimension_semantics = [#tpu.dimension_semantics<arbitrary>], iteration_bounds = array<i64: 1>, scalar_prefetch = 0 : i64, scratch_operands = 1 : i64, tpu.core_type = #tpu.core_type<tc>, window_params = [{pipeline_mode = #tpu.pipeline_mode<synchronous>, transform_indices = @transform_0, window_bounds = array<i64: 4, 20, 40>}, {pipeline_mode = #tpu.pipeline_mode<synchronous>, transform_indices = @transform_1, window_bounds = array<i64: 324, 36>}, {pipeline_mode = #tpu.pipeline_mode<synchronous>, transform_indices = @transform_2, window_bounds = array<i64: 324, 3>}, {pipeline_mode = #tpu.pipeline_mode<synchronous>, transform_indices = @transform_3, window_bounds = array<i64: 35, 32>}, {pipeline_mode = #tpu.pipeline_mode<synchronous>, transform_indices = @transform_4, window_bounds = array<i64: 2, 3>}]} {
    %c0 = arith.constant 0 : index
    %c0_0 = arith.constant 0 : index
    %c0_1 = arith.constant 0 : index
    %0 = vector.load %arg1[%c0, %c0_0, %c0_1] : memref<4x20x40xf32, #tpu.memory_space<vmem>>, vector<1x18x36xf32>
    %1 = vector.shape_cast %0 : vector<1x18x36xf32> to vector<18x36xf32>
    %c0_2 = arith.constant 0 : index
    %c0_3 = arith.constant 0 : index
    %2 = vector.load %arg2[%c0_2, %c0_3] : memref<324x36xf32, #tpu.memory_space<vmem>>, vector<36x36xf32>
    %cst = arith.constant dense<0.000000e+00> : vector<18x36xf32>
    %3 = tpu.matmul %1, %2, %cst {dimension_numbers = #tpu.dot_dimension_numbers<[1], [0], [0], [1], [0, 0, 1, 1], [], []>} : vector<18x36xf32>, vector<36x36xf32>, vector<18x36xf32> -> vector<18x36xf32>
    %c1 = arith.constant 1 : index
    %c0_4 = arith.constant 0 : index
    %c0_5 = arith.constant 0 : index
    %4 = vector.load %arg1[%c1, %c0_4, %c0_5] : memref<4x20x40xf32, #tpu.memory_space<vmem>>, vector<1x18x36xf32>
    %5 = vector.shape_cast %4 : vector<1x18x36xf32> to vector<18x36xf32>
    %c36 = arith.constant 36 : index
    %c0_6 = arith.constant 0 : index
    %6 = vector.load %arg2[%c36, %c0_6] : memref<324x36xf32, #tpu.memory_space<vmem>>, vector<36x36xf32>
    %cst_7 = arith.constant dense<0.000000e+00> : vector<18x36xf32>
    %7 = tpu.matmul %5, %6, %cst_7 {dimension_numbers = #tpu.dot_dimension_numbers<[1], [0], [0], [1], [0, 0, 1, 1], [], []>} : vector<18x36xf32>, vector<36x36xf32>, vector<18x36xf32> -> vector<18x36xf32>
    %8 = arith.addf %3, %7 : vector<18x36xf32>
    %c0_8 = arith.constant 0 : index
    %c0_9 = arith.constant 0 : index
    %c4 = arith.constant 4 : index
    %9 = vector.load %arg1[%c0_8, %c0_9, %c4] : memref<4x20x40xf32, #tpu.memory_space<vmem>>, vector<1x18x36xf32>
    %10 = vector.shape_cast %9 : vector<1x18x36xf32> to vector<18x36xf32>
    %c72 = arith.constant 72 : index
    %c0_10 = arith.constant 0 : index
    %11 = vector.load %arg2[%c72, %c0_10] : memref<324x36xf32, #tpu.memory_space<vmem>>, vector<36x36xf32>
    %cst_11 = arith.constant dense<0.000000e+00> : vector<18x36xf32>
    %12 = tpu.matmul %10, %11, %cst_11 {dimension_numbers = #tpu.dot_dimension_numbers<[1], [0], [0], [1], [0, 0, 1, 1], [], []>} : vector<18x36xf32>, vector<36x36xf32>, vector<18x36xf32> -> vector<18x36xf32>
    %13 = arith.addf %8, %12 : vector<18x36xf32>
    %c2 = arith.constant 2 : index
    %c0_12 = arith.constant 0 : index
    %c0_13 = arith.constant 0 : index
    %14 = vector.load %arg1[%c2, %c0_12, %c0_13] : memref<4x20x40xf32, #tpu.memory_space<vmem>>, vector<1x18x36xf32>
    %15 = vector.shape_cast %14 : vector<1x18x36xf32> to vector<18x36xf32>
    %c108 = arith.constant 108 : index
    %c0_14 = arith.constant 0 : index
    %16 = vector.load %arg2[%c108, %c0_14] : memref<324x36xf32, #tpu.memory_space<vmem>>, vector<36x36xf32>
    %cst_15 = arith.constant dense<0.000000e+00> : vector<18x36xf32>
    %17 = tpu.matmul %15, %16, %cst_15 {dimension_numbers = #tpu.dot_dimension_numbers<[1], [0], [0], [1], [0, 0, 1, 1], [], []>} : vector<18x36xf32>, vector<36x36xf32>, vector<18x36xf32> -> vector<18x36xf32>
    %18 = arith.addf %13, %17 : vector<18x36xf32>
    %c3 = arith.constant 3 : index
    %c0_16 = arith.constant 0 : index
    %c0_17 = arith.constant 0 : index
    %19 = vector.load %arg1[%c3, %c0_16, %c0_17] : memref<4x20x40xf32, #tpu.memory_space<vmem>>, vector<1x18x36xf32>
    %20 = vector.shape_cast %19 : vector<1x18x36xf32> to vector<18x36xf32>
    %c144 = arith.constant 144 : index
    %c0_18 = arith.constant 0 : index
    %21 = vector.load %arg2[%c144, %c0_18] : memref<324x36xf32, #tpu.memory_space<vmem>>, vector<36x36xf32>
    %cst_19 = arith.constant dense<0.000000e+00> : vector<18x36xf32>
    %22 = tpu.matmul %20, %21, %cst_19 {dimension_numbers = #tpu.dot_dimension_numbers<[1], [0], [0], [1], [0, 0, 1, 1], [], []>} : vector<18x36xf32>, vector<36x36xf32>, vector<18x36xf32> -> vector<18x36xf32>
    %23 = arith.addf %18, %22 : vector<18x36xf32>
    %c2_20 = arith.constant 2 : index
    %c0_21 = arith.constant 0 : index
    %c4_22 = arith.constant 4 : index
    %24 = vector.load %arg1[%c2_20, %c0_21, %c4_22] : memref<4x20x40xf32, #tpu.memory_space<vmem>>, vector<1x18x36xf32>
    %25 = vector.shape_cast %24 : vector<1x18x36xf32> to vector<18x36xf32>
    %c180 = arith.constant 180 : index
    %c0_23 = arith.constant 0 : index
    %26 = vector.load %arg2[%c180, %c0_23] : memref<324x36xf32, #tpu.memory_space<vmem>>, vector<36x36xf32>
    %cst_24 = arith.constant dense<0.000000e+00> : vector<18x36xf32>
    %27 = tpu.matmul %25, %26, %cst_24 {dimension_numbers = #tpu.dot_dimension_numbers<[1], [0], [0], [1], [0, 0, 1, 1], [], []>} : vector<18x36xf32>, vector<36x36xf32>, vector<18x36xf32> -> vector<18x36xf32>
    %28 = arith.addf %23, %27 : vector<18x36xf32>
    %c0_25 = arith.constant 0 : index
    %c2_26 = arith.constant 2 : index
    %c0_27 = arith.constant 0 : index
    %29 = vector.load %arg1[%c0_25, %c2_26, %c0_27] : memref<4x20x40xf32, #tpu.memory_space<vmem>>, vector<1x18x36xf32>
    %30 = vector.shape_cast %29 : vector<1x18x36xf32> to vector<18x36xf32>
    %c216 = arith.constant 216 : index
    %c0_28 = arith.constant 0 : index
    %31 = vector.load %arg2[%c216, %c0_28] : memref<324x36xf32, #tpu.memory_space<vmem>>, vector<36x36xf32>
    %cst_29 = arith.constant dense<0.000000e+00> : vector<18x36xf32>
    %32 = tpu.matmul %30, %31, %cst_29 {dimension_numbers = #tpu.dot_dimension_numbers<[1], [0], [0], [1], [0, 0, 1, 1], [], []>} : vector<18x36xf32>, vector<36x36xf32>, vector<18x36xf32> -> vector<18x36xf32>
    %33 = arith.addf %28, %32 : vector<18x36xf32>
    %c1_30 = arith.constant 1 : index
    %c2_31 = arith.constant 2 : index
    %c0_32 = arith.constant 0 : index
    %34 = vector.load %arg1[%c1_30, %c2_31, %c0_32] : memref<4x20x40xf32, #tpu.memory_space<vmem>>, vector<1x18x36xf32>
    %35 = vector.shape_cast %34 : vector<1x18x36xf32> to vector<18x36xf32>
    %c252 = arith.constant 252 : index
    %c0_33 = arith.constant 0 : index
    %36 = vector.load %arg2[%c252, %c0_33] : memref<324x36xf32, #tpu.memory_space<vmem>>, vector<36x36xf32>
    %cst_34 = arith.constant dense<0.000000e+00> : vector<18x36xf32>
    %37 = tpu.matmul %35, %36, %cst_34 {dimension_numbers = #tpu.dot_dimension_numbers<[1], [0], [0], [1], [0, 0, 1, 1], [], []>} : vector<18x36xf32>, vector<36x36xf32>, vector<18x36xf32> -> vector<18x36xf32>
    %38 = arith.addf %33, %37 : vector<18x36xf32>
    %c0_35 = arith.constant 0 : index
    %c2_36 = arith.constant 2 : index
    %c4_37 = arith.constant 4 : index
    %39 = vector.load %arg1[%c0_35, %c2_36, %c4_37] : memref<4x20x40xf32, #tpu.memory_space<vmem>>, vector<1x18x36xf32>
    %40 = vector.shape_cast %39 : vector<1x18x36xf32> to vector<18x36xf32>
    %c288 = arith.constant 288 : index
    %c0_38 = arith.constant 0 : index
    %41 = vector.load %arg2[%c288, %c0_38] : memref<324x36xf32, #tpu.memory_space<vmem>>, vector<36x36xf32>
    %cst_39 = arith.constant dense<0.000000e+00> : vector<18x36xf32>
    %42 = tpu.matmul %40, %41, %cst_39 {dimension_numbers = #tpu.dot_dimension_numbers<[1], [0], [0], [1], [0, 0, 1, 1], [], []>} : vector<18x36xf32>, vector<36x36xf32>, vector<18x36xf32> -> vector<18x36xf32>
    %43 = arith.addf %38, %42 : vector<18x36xf32>
    %44 = vector.extract_strided_slice %43 {offsets = [2, 4], sizes = [16, 32], strides = [1, 1]} : vector<18x36xf32> to vector<16x32xf32>
    %45 = arith.mulf %44, %44 : vector<16x32xf32>
    %c1_40 = arith.constant 1 : index
    %c0_41 = arith.constant 0 : index
    %c0_42 = arith.constant 0 : index
    %46 = vector.load %arg1[%c1_40, %c0_41, %c0_42] : memref<4x20x40xf32, #tpu.memory_space<vmem>>, vector<1x18x36xf32>
    %47 = vector.shape_cast %46 : vector<1x18x36xf32> to vector<18x36xf32>
    %c0_43 = arith.constant 0 : index
    %c0_44 = arith.constant 0 : index
    %48 = vector.load %arg2[%c0_43, %c0_44] : memref<324x36xf32, #tpu.memory_space<vmem>>, vector<36x36xf32>
    %cst_45 = arith.constant dense<0.000000e+00> : vector<18x36xf32>
    %49 = tpu.matmul %47, %48, %cst_45 {dimension_numbers = #tpu.dot_dimension_numbers<[1], [0], [0], [1], [0, 0, 1, 1], [], []>} : vector<18x36xf32>, vector<36x36xf32>, vector<18x36xf32> -> vector<18x36xf32>
    %c0_46 = arith.constant 0 : index
    %c0_47 = arith.constant 0 : index
    %c4_48 = arith.constant 4 : index
    %50 = vector.load %arg1[%c0_46, %c0_47, %c4_48] : memref<4x20x40xf32, #tpu.memory_space<vmem>>, vector<1x18x36xf32>
    %51 = vector.shape_cast %50 : vector<1x18x36xf32> to vector<18x36xf32>
    %c36_49 = arith.constant 36 : index
    %c0_50 = arith.constant 0 : index
    %52 = vector.load %arg2[%c36_49, %c0_50] : memref<324x36xf32, #tpu.memory_space<vmem>>, vector<36x36xf32>
    %cst_51 = arith.constant dense<0.000000e+00> : vector<18x36xf32>
    %53 = tpu.matmul %51, %52, %cst_51 {dimension_numbers = #tpu.dot_dimension_numbers<[1], [0], [0], [1], [0, 0, 1, 1], [], []>} : vector<18x36xf32>, vector<36x36xf32>, vector<18x36xf32> -> vector<18x36xf32>
    %54 = arith.addf %49, %53 : vector<18x36xf32>
    %c1_52 = arith.constant 1 : index
    %c0_53 = arith.constant 0 : index
    %c4_54 = arith.constant 4 : index
    %55 = vector.load %arg1[%c1_52, %c0_53, %c4_54] : memref<4x20x40xf32, #tpu.memory_space<vmem>>, vector<1x18x36xf32>
    %56 = vector.shape_cast %55 : vector<1x18x36xf32> to vector<18x36xf32>
    %c72_55 = arith.constant 72 : index
    %c0_56 = arith.constant 0 : index
    %57 = vector.load %arg2[%c72_55, %c0_56] : memref<324x36xf32, #tpu.memory_space<vmem>>, vector<36x36xf32>
    %cst_57 = arith.constant dense<0.000000e+00> : vector<18x36xf32>
    %58 = tpu.matmul %56, %57, %cst_57 {dimension_numbers = #tpu.dot_dimension_numbers<[1], [0], [0], [1], [0, 0, 1, 1], [], []>} : vector<18x36xf32>, vector<36x36xf32>, vector<18x36xf32> -> vector<18x36xf32>
    %59 = arith.addf %54, %58 : vector<18x36xf32>
    %c3_58 = arith.constant 3 : index
    %c0_59 = arith.constant 0 : index
    %c0_60 = arith.constant 0 : index
    %60 = vector.load %arg1[%c3_58, %c0_59, %c0_60] : memref<4x20x40xf32, #tpu.memory_space<vmem>>, vector<1x18x36xf32>
    %61 = vector.shape_cast %60 : vector<1x18x36xf32> to vector<18x36xf32>
    %c108_61 = arith.constant 108 : index
    %c0_62 = arith.constant 0 : index
    %62 = vector.load %arg2[%c108_61, %c0_62] : memref<324x36xf32, #tpu.memory_space<vmem>>, vector<36x36xf32>
    %cst_63 = arith.constant dense<0.000000e+00> : vector<18x36xf32>
    %63 = tpu.matmul %61, %62, %cst_63 {dimension_numbers = #tpu.dot_dimension_numbers<[1], [0], [0], [1], [0, 0, 1, 1], [], []>} : vector<18x36xf32>, vector<36x36xf32>, vector<18x36xf32> -> vector<18x36xf32>
    %64 = arith.addf %59, %63 : vector<18x36xf32>
    %c2_64 = arith.constant 2 : index
    %c0_65 = arith.constant 0 : index
    %c4_66 = arith.constant 4 : index
    %65 = vector.load %arg1[%c2_64, %c0_65, %c4_66] : memref<4x20x40xf32, #tpu.memory_space<vmem>>, vector<1x18x36xf32>
    %66 = vector.shape_cast %65 : vector<1x18x36xf32> to vector<18x36xf32>
    %c144_67 = arith.constant 144 : index
    %c0_68 = arith.constant 0 : index
    %67 = vector.load %arg2[%c144_67, %c0_68] : memref<324x36xf32, #tpu.memory_space<vmem>>, vector<36x36xf32>
    %cst_69 = arith.constant dense<0.000000e+00> : vector<18x36xf32>
    %68 = tpu.matmul %66, %67, %cst_69 {dimension_numbers = #tpu.dot_dimension_numbers<[1], [0], [0], [1], [0, 0, 1, 1], [], []>} : vector<18x36xf32>, vector<36x36xf32>, vector<18x36xf32> -> vector<18x36xf32>
    %69 = arith.addf %64, %68 : vector<18x36xf32>
    %c3_70 = arith.constant 3 : index
    %c0_71 = arith.constant 0 : index
    %c4_72 = arith.constant 4 : index
    %70 = vector.load %arg1[%c3_70, %c0_71, %c4_72] : memref<4x20x40xf32, #tpu.memory_space<vmem>>, vector<1x18x36xf32>
    %71 = vector.shape_cast %70 : vector<1x18x36xf32> to vector<18x36xf32>
    %c180_73 = arith.constant 180 : index
    %c0_74 = arith.constant 0 : index
    %72 = vector.load %arg2[%c180_73, %c0_74] : memref<324x36xf32, #tpu.memory_space<vmem>>, vector<36x36xf32>
    %cst_75 = arith.constant dense<0.000000e+00> : vector<18x36xf32>
    %73 = tpu.matmul %71, %72, %cst_75 {dimension_numbers = #tpu.dot_dimension_numbers<[1], [0], [0], [1], [0, 0, 1, 1], [], []>} : vector<18x36xf32>, vector<36x36xf32>, vector<18x36xf32> -> vector<18x36xf32>
    %74 = arith.addf %69, %73 : vector<18x36xf32>
    %c1_76 = arith.constant 1 : index
    %c2_77 = arith.constant 2 : index
    %c0_78 = arith.constant 0 : index
    %75 = vector.load %arg1[%c1_76, %c2_77, %c0_78] : memref<4x20x40xf32, #tpu.memory_space<vmem>>, vector<1x18x36xf32>
    %76 = vector.shape_cast %75 : vector<1x18x36xf32> to vector<18x36xf32>
    %c216_79 = arith.constant 216 : index
    %c0_80 = arith.constant 0 : index
    %77 = vector.load %arg2[%c216_79, %c0_80] : memref<324x36xf32, #tpu.memory_space<vmem>>, vector<36x36xf32>
    %cst_81 = arith.constant dense<0.000000e+00> : vector<18x36xf32>
    %78 = tpu.matmul %76, %77, %cst_81 {dimension_numbers = #tpu.dot_dimension_numbers<[1], [0], [0], [1], [0, 0, 1, 1], [], []>} : vector<18x36xf32>, vector<36x36xf32>, vector<18x36xf32> -> vector<18x36xf32>
    %79 = arith.addf %74, %78 : vector<18x36xf32>
    %c0_82 = arith.constant 0 : index
    %c2_83 = arith.constant 2 : index
    %c4_84 = arith.constant 4 : index
    %80 = vector.load %arg1[%c0_82, %c2_83, %c4_84] : memref<4x20x40xf32, #tpu.memory_space<vmem>>, vector<1x18x36xf32>
    %81 = vector.shape_cast %80 : vector<1x18x36xf32> to vector<18x36xf32>
    %c252_85 = arith.constant 252 : index
    %c0_86 = arith.constant 0 : index
    %82 = vector.load %arg2[%c252_85, %c0_86] : memref<324x36xf32, #tpu.memory_space<vmem>>, vector<36x36xf32>
    %cst_87 = arith.constant dense<0.000000e+00> : vector<18x36xf32>
    %83 = tpu.matmul %81, %82, %cst_87 {dimension_numbers = #tpu.dot_dimension_numbers<[1], [0], [0], [1], [0, 0, 1, 1], [], []>} : vector<18x36xf32>, vector<36x36xf32>, vector<18x36xf32> -> vector<18x36xf32>
    %84 = arith.addf %79, %83 : vector<18x36xf32>
    %c1_88 = arith.constant 1 : index
    %c2_89 = arith.constant 2 : index
    %c4_90 = arith.constant 4 : index
    %85 = vector.load %arg1[%c1_88, %c2_89, %c4_90] : memref<4x20x40xf32, #tpu.memory_space<vmem>>, vector<1x18x36xf32>
    %86 = vector.shape_cast %85 : vector<1x18x36xf32> to vector<18x36xf32>
    %c288_91 = arith.constant 288 : index
    %c0_92 = arith.constant 0 : index
    %87 = vector.load %arg2[%c288_91, %c0_92] : memref<324x36xf32, #tpu.memory_space<vmem>>, vector<36x36xf32>
    %cst_93 = arith.constant dense<0.000000e+00> : vector<18x36xf32>
    %88 = tpu.matmul %86, %87, %cst_93 {dimension_numbers = #tpu.dot_dimension_numbers<[1], [0], [0], [1], [0, 0, 1, 1], [], []>} : vector<18x36xf32>, vector<36x36xf32>, vector<18x36xf32> -> vector<18x36xf32>
    %89 = arith.addf %84, %88 : vector<18x36xf32>
    %90 = vector.extract_strided_slice %89 {offsets = [2, 0], sizes = [16, 32], strides = [1, 1]} : vector<18x36xf32> to vector<16x32xf32>
    %91 = arith.addf %44, %90 : vector<16x32xf32>
    %92 = arith.mulf %90, %90 : vector<16x32xf32>
    %93 = arith.addf %45, %92 : vector<16x32xf32>
    %c2_94 = arith.constant 2 : index
    %c0_95 = arith.constant 0 : index
    %c0_96 = arith.constant 0 : index
    %94 = vector.load %arg1[%c2_94, %c0_95, %c0_96] : memref<4x20x40xf32, #tpu.memory_space<vmem>>, vector<1x18x36xf32>
    %95 = vector.shape_cast %94 : vector<1x18x36xf32> to vector<18x36xf32>
    %c0_97 = arith.constant 0 : index
    %c0_98 = arith.constant 0 : index
    %96 = vector.load %arg2[%c0_97, %c0_98] : memref<324x36xf32, #tpu.memory_space<vmem>>, vector<36x36xf32>
    %cst_99 = arith.constant dense<0.000000e+00> : vector<18x36xf32>
    %97 = tpu.matmul %95, %96, %cst_99 {dimension_numbers = #tpu.dot_dimension_numbers<[1], [0], [0], [1], [0, 0, 1, 1], [], []>} : vector<18x36xf32>, vector<36x36xf32>, vector<18x36xf32> -> vector<18x36xf32>
    %c3_100 = arith.constant 3 : index
    %c0_101 = arith.constant 0 : index
    %c0_102 = arith.constant 0 : index
    %98 = vector.load %arg1[%c3_100, %c0_101, %c0_102] : memref<4x20x40xf32, #tpu.memory_space<vmem>>, vector<1x18x36xf32>
    %99 = vector.shape_cast %98 : vector<1x18x36xf32> to vector<18x36xf32>
    %c36_103 = arith.constant 36 : index
    %c0_104 = arith.constant 0 : index
    %100 = vector.load %arg2[%c36_103, %c0_104] : memref<324x36xf32, #tpu.memory_space<vmem>>, vector<36x36xf32>
    %cst_105 = arith.constant dense<0.000000e+00> : vector<18x36xf32>
    %101 = tpu.matmul %99, %100, %cst_105 {dimension_numbers = #tpu.dot_dimension_numbers<[1], [0], [0], [1], [0, 0, 1, 1], [], []>} : vector<18x36xf32>, vector<36x36xf32>, vector<18x36xf32> -> vector<18x36xf32>
    %102 = arith.addf %97, %101 : vector<18x36xf32>
    %c2_106 = arith.constant 2 : index
    %c0_107 = arith.constant 0 : index
    %c4_108 = arith.constant 4 : index
    %103 = vector.load %arg1[%c2_106, %c0_107, %c4_108] : memref<4x20x40xf32, #tpu.memory_space<vmem>>, vector<1x18x36xf32>
    %104 = vector.shape_cast %103 : vector<1x18x36xf32> to vector<18x36xf32>
    %c72_109 = arith.constant 72 : index
    %c0_110 = arith.constant 0 : index
    %105 = vector.load %arg2[%c72_109, %c0_110] : memref<324x36xf32, #tpu.memory_space<vmem>>, vector<36x36xf32>
    %cst_111 = arith.constant dense<0.000000e+00> : vector<18x36xf32>
    %106 = tpu.matmul %104, %105, %cst_111 {dimension_numbers = #tpu.dot_dimension_numbers<[1], [0], [0], [1], [0, 0, 1, 1], [], []>} : vector<18x36xf32>, vector<36x36xf32>, vector<18x36xf32> -> vector<18x36xf32>
    %107 = arith.addf %102, %106 : vector<18x36xf32>
    %c0_112 = arith.constant 0 : index
    %c2_113 = arith.constant 2 : index
    %c0_114 = arith.constant 0 : index
    %108 = vector.load %arg1[%c0_112, %c2_113, %c0_114] : memref<4x20x40xf32, #tpu.memory_space<vmem>>, vector<1x18x36xf32>
    %109 = vector.shape_cast %108 : vector<1x18x36xf32> to vector<18x36xf32>
    %c108_115 = arith.constant 108 : index
    %c0_116 = arith.constant 0 : index
    %110 = vector.load %arg2[%c108_115, %c0_116] : memref<324x36xf32, #tpu.memory_space<vmem>>, vector<36x36xf32>
    %cst_117 = arith.constant dense<0.000000e+00> : vector<18x36xf32>
    %111 = tpu.matmul %109, %110, %cst_117 {dimension_numbers = #tpu.dot_dimension_numbers<[1], [0], [0], [1], [0, 0, 1, 1], [], []>} : vector<18x36xf32>, vector<36x36xf32>, vector<18x36xf32> -> vector<18x36xf32>
    %112 = arith.addf %107, %111 : vector<18x36xf32>
    %c1_118 = arith.constant 1 : index
    %c2_119 = arith.constant 2 : index
    %c0_120 = arith.constant 0 : index
    %113 = vector.load %arg1[%c1_118, %c2_119, %c0_120] : memref<4x20x40xf32, #tpu.memory_space<vmem>>, vector<1x18x36xf32>
    %114 = vector.shape_cast %113 : vector<1x18x36xf32> to vector<18x36xf32>
    %c144_121 = arith.constant 144 : index
    %c0_122 = arith.constant 0 : index
    %115 = vector.load %arg2[%c144_121, %c0_122] : memref<324x36xf32, #tpu.memory_space<vmem>>, vector<36x36xf32>
    %cst_123 = arith.constant dense<0.000000e+00> : vector<18x36xf32>
    %116 = tpu.matmul %114, %115, %cst_123 {dimension_numbers = #tpu.dot_dimension_numbers<[1], [0], [0], [1], [0, 0, 1, 1], [], []>} : vector<18x36xf32>, vector<36x36xf32>, vector<18x36xf32> -> vector<18x36xf32>
    %117 = arith.addf %112, %116 : vector<18x36xf32>
    %c0_124 = arith.constant 0 : index
    %c2_125 = arith.constant 2 : index
    %c4_126 = arith.constant 4 : index
    %118 = vector.load %arg1[%c0_124, %c2_125, %c4_126] : memref<4x20x40xf32, #tpu.memory_space<vmem>>, vector<1x18x36xf32>
    %119 = vector.shape_cast %118 : vector<1x18x36xf32> to vector<18x36xf32>
    %c180_127 = arith.constant 180 : index
    %c0_128 = arith.constant 0 : index
    %120 = vector.load %arg2[%c180_127, %c0_128] : memref<324x36xf32, #tpu.memory_space<vmem>>, vector<36x36xf32>
    %cst_129 = arith.constant dense<0.000000e+00> : vector<18x36xf32>
    %121 = tpu.matmul %119, %120, %cst_129 {dimension_numbers = #tpu.dot_dimension_numbers<[1], [0], [0], [1], [0, 0, 1, 1], [], []>} : vector<18x36xf32>, vector<36x36xf32>, vector<18x36xf32> -> vector<18x36xf32>
    %122 = arith.addf %117, %121 : vector<18x36xf32>
    %c2_130 = arith.constant 2 : index
    %c2_131 = arith.constant 2 : index
    %c0_132 = arith.constant 0 : index
    %123 = vector.load %arg1[%c2_130, %c2_131, %c0_132] : memref<4x20x40xf32, #tpu.memory_space<vmem>>, vector<1x18x36xf32>
    %124 = vector.shape_cast %123 : vector<1x18x36xf32> to vector<18x36xf32>
    %c216_133 = arith.constant 216 : index
    %c0_134 = arith.constant 0 : index
    %125 = vector.load %arg2[%c216_133, %c0_134] : memref<324x36xf32, #tpu.memory_space<vmem>>, vector<36x36xf32>
    %cst_135 = arith.constant dense<0.000000e+00> : vector<18x36xf32>
    %126 = tpu.matmul %124, %125, %cst_135 {dimension_numbers = #tpu.dot_dimension_numbers<[1], [0], [0], [1], [0, 0, 1, 1], [], []>} : vector<18x36xf32>, vector<36x36xf32>, vector<18x36xf32> -> vector<18x36xf32>
    %127 = arith.addf %122, %126 : vector<18x36xf32>
    %c3_136 = arith.constant 3 : index
    %c2_137 = arith.constant 2 : index
    %c0_138 = arith.constant 0 : index
    %128 = vector.load %arg1[%c3_136, %c2_137, %c0_138] : memref<4x20x40xf32, #tpu.memory_space<vmem>>, vector<1x18x36xf32>
    %129 = vector.shape_cast %128 : vector<1x18x36xf32> to vector<18x36xf32>
    %c252_139 = arith.constant 252 : index
    %c0_140 = arith.constant 0 : index
    %130 = vector.load %arg2[%c252_139, %c0_140] : memref<324x36xf32, #tpu.memory_space<vmem>>, vector<36x36xf32>
    %cst_141 = arith.constant dense<0.000000e+00> : vector<18x36xf32>
    %131 = tpu.matmul %129, %130, %cst_141 {dimension_numbers = #tpu.dot_dimension_numbers<[1], [0], [0], [1], [0, 0, 1, 1], [], []>} : vector<18x36xf32>, vector<36x36xf32>, vector<18x36xf32> -> vector<18x36xf32>
    %132 = arith.addf %127, %131 : vector<18x36xf32>
    %c2_142 = arith.constant 2 : index
    %c2_143 = arith.constant 2 : index
    %c4_144 = arith.constant 4 : index
    %133 = vector.load %arg1[%c2_142, %c2_143, %c4_144] : memref<4x20x40xf32, #tpu.memory_space<vmem>>, vector<1x18x36xf32>
    %134 = vector.shape_cast %133 : vector<1x18x36xf32> to vector<18x36xf32>
    %c288_145 = arith.constant 288 : index
    %c0_146 = arith.constant 0 : index
    %135 = vector.load %arg2[%c288_145, %c0_146] : memref<324x36xf32, #tpu.memory_space<vmem>>, vector<36x36xf32>
    %cst_147 = arith.constant dense<0.000000e+00> : vector<18x36xf32>
    %136 = tpu.matmul %134, %135, %cst_147 {dimension_numbers = #tpu.dot_dimension_numbers<[1], [0], [0], [1], [0, 0, 1, 1], [], []>} : vector<18x36xf32>, vector<36x36xf32>, vector<18x36xf32> -> vector<18x36xf32>
    %137 = arith.addf %132, %136 : vector<18x36xf32>
    %138 = vector.extract_strided_slice %137 {offsets = [0, 4], sizes = [16, 32], strides = [1, 1]} : vector<18x36xf32> to vector<16x32xf32>
    %139 = arith.addf %91, %138 : vector<16x32xf32>
    %140 = arith.mulf %138, %138 : vector<16x32xf32>
    %141 = arith.addf %93, %140 : vector<16x32xf32>
    %c3_148 = arith.constant 3 : index
    %c0_149 = arith.constant 0 : index
    %c0_150 = arith.constant 0 : index
    %142 = vector.load %arg1[%c3_148, %c0_149, %c0_150] : memref<4x20x40xf32, #tpu.memory_space<vmem>>, vector<1x18x36xf32>
    %143 = vector.shape_cast %142 : vector<1x18x36xf32> to vector<18x36xf32>
    %c0_151 = arith.constant 0 : index
    %c0_152 = arith.constant 0 : index
    %144 = vector.load %arg2[%c0_151, %c0_152] : memref<324x36xf32, #tpu.memory_space<vmem>>, vector<36x36xf32>
    %cst_153 = arith.constant dense<0.000000e+00> : vector<18x36xf32>
    %145 = tpu.matmul %143, %144, %cst_153 {dimension_numbers = #tpu.dot_dimension_numbers<[1], [0], [0], [1], [0, 0, 1, 1], [], []>} : vector<18x36xf32>, vector<36x36xf32>, vector<18x36xf32> -> vector<18x36xf32>
    %c2_154 = arith.constant 2 : index
    %c0_155 = arith.constant 0 : index
    %c4_156 = arith.constant 4 : index
    %146 = vector.load %arg1[%c2_154, %c0_155, %c4_156] : memref<4x20x40xf32, #tpu.memory_space<vmem>>, vector<1x18x36xf32>
    %147 = vector.shape_cast %146 : vector<1x18x36xf32> to vector<18x36xf32>
    %c36_157 = arith.constant 36 : index
    %c0_158 = arith.constant 0 : index
    %148 = vector.load %arg2[%c36_157, %c0_158] : memref<324x36xf32, #tpu.memory_space<vmem>>, vector<36x36xf32>
    %cst_159 = arith.constant dense<0.000000e+00> : vector<18x36xf32>
    %149 = tpu.matmul %147, %148, %cst_159 {dimension_numbers = #tpu.dot_dimension_numbers<[1], [0], [0], [1], [0, 0, 1, 1], [], []>} : vector<18x36xf32>, vector<36x36xf32>, vector<18x36xf32> -> vector<18x36xf32>
    %150 = arith.addf %145, %149 : vector<18x36xf32>
    %c3_160 = arith.constant 3 : index
    %c0_161 = arith.constant 0 : index
    %c4_162 = arith.constant 4 : index
    %151 = vector.load %arg1[%c3_160, %c0_161, %c4_162] : memref<4x20x40xf32, #tpu.memory_space<vmem>>, vector<1x18x36xf32>
    %152 = vector.shape_cast %151 : vector<1x18x36xf32> to vector<18x36xf32>
    %c72_163 = arith.constant 72 : index
    %c0_164 = arith.constant 0 : index
    %153 = vector.load %arg2[%c72_163, %c0_164] : memref<324x36xf32, #tpu.memory_space<vmem>>, vector<36x36xf32>
    %cst_165 = arith.constant dense<0.000000e+00> : vector<18x36xf32>
    %154 = tpu.matmul %152, %153, %cst_165 {dimension_numbers = #tpu.dot_dimension_numbers<[1], [0], [0], [1], [0, 0, 1, 1], [], []>} : vector<18x36xf32>, vector<36x36xf32>, vector<18x36xf32> -> vector<18x36xf32>
    %155 = arith.addf %150, %154 : vector<18x36xf32>
    %c1_166 = arith.constant 1 : index
    %c2_167 = arith.constant 2 : index
    %c0_168 = arith.constant 0 : index
    %156 = vector.load %arg1[%c1_166, %c2_167, %c0_168] : memref<4x20x40xf32, #tpu.memory_space<vmem>>, vector<1x18x36xf32>
    %157 = vector.shape_cast %156 : vector<1x18x36xf32> to vector<18x36xf32>
    %c108_169 = arith.constant 108 : index
    %c0_170 = arith.constant 0 : index
    %158 = vector.load %arg2[%c108_169, %c0_170] : memref<324x36xf32, #tpu.memory_space<vmem>>, vector<36x36xf32>
    %cst_171 = arith.constant dense<0.000000e+00> : vector<18x36xf32>
    %159 = tpu.matmul %157, %158, %cst_171 {dimension_numbers = #tpu.dot_dimension_numbers<[1], [0], [0], [1], [0, 0, 1, 1], [], []>} : vector<18x36xf32>, vector<36x36xf32>, vector<18x36xf32> -> vector<18x36xf32>
    %160 = arith.addf %155, %159 : vector<18x36xf32>
    %c0_172 = arith.constant 0 : index
    %c2_173 = arith.constant 2 : index
    %c4_174 = arith.constant 4 : index
    %161 = vector.load %arg1[%c0_172, %c2_173, %c4_174] : memref<4x20x40xf32, #tpu.memory_space<vmem>>, vector<1x18x36xf32>
    %162 = vector.shape_cast %161 : vector<1x18x36xf32> to vector<18x36xf32>
    %c144_175 = arith.constant 144 : index
    %c0_176 = arith.constant 0 : index
    %163 = vector.load %arg2[%c144_175, %c0_176] : memref<324x36xf32, #tpu.memory_space<vmem>>, vector<36x36xf32>
    %cst_177 = arith.constant dense<0.000000e+00> : vector<18x36xf32>
    %164 = tpu.matmul %162, %163, %cst_177 {dimension_numbers = #tpu.dot_dimension_numbers<[1], [0], [0], [1], [0, 0, 1, 1], [], []>} : vector<18x36xf32>, vector<36x36xf32>, vector<18x36xf32> -> vector<18x36xf32>
    %165 = arith.addf %160, %164 : vector<18x36xf32>
    %c1_178 = arith.constant 1 : index
    %c2_179 = arith.constant 2 : index
    %c4_180 = arith.constant 4 : index
    %166 = vector.load %arg1[%c1_178, %c2_179, %c4_180] : memref<4x20x40xf32, #tpu.memory_space<vmem>>, vector<1x18x36xf32>
    %167 = vector.shape_cast %166 : vector<1x18x36xf32> to vector<18x36xf32>
    %c180_181 = arith.constant 180 : index
    %c0_182 = arith.constant 0 : index
    %168 = vector.load %arg2[%c180_181, %c0_182] : memref<324x36xf32, #tpu.memory_space<vmem>>, vector<36x36xf32>
    %cst_183 = arith.constant dense<0.000000e+00> : vector<18x36xf32>
    %169 = tpu.matmul %167, %168, %cst_183 {dimension_numbers = #tpu.dot_dimension_numbers<[1], [0], [0], [1], [0, 0, 1, 1], [], []>} : vector<18x36xf32>, vector<36x36xf32>, vector<18x36xf32> -> vector<18x36xf32>
    %170 = arith.addf %165, %169 : vector<18x36xf32>
    %c3_184 = arith.constant 3 : index
    %c2_185 = arith.constant 2 : index
    %c0_186 = arith.constant 0 : index
    %171 = vector.load %arg1[%c3_184, %c2_185, %c0_186] : memref<4x20x40xf32, #tpu.memory_space<vmem>>, vector<1x18x36xf32>
    %172 = vector.shape_cast %171 : vector<1x18x36xf32> to vector<18x36xf32>
    %c216_187 = arith.constant 216 : index
    %c0_188 = arith.constant 0 : index
    %173 = vector.load %arg2[%c216_187, %c0_188] : memref<324x36xf32, #tpu.memory_space<vmem>>, vector<36x36xf32>
    %cst_189 = arith.constant dense<0.000000e+00> : vector<18x36xf32>
    %174 = tpu.matmul %172, %173, %cst_189 {dimension_numbers = #tpu.dot_dimension_numbers<[1], [0], [0], [1], [0, 0, 1, 1], [], []>} : vector<18x36xf32>, vector<36x36xf32>, vector<18x36xf32> -> vector<18x36xf32>
    %175 = arith.addf %170, %174 : vector<18x36xf32>
    %c2_190 = arith.constant 2 : index
    %c2_191 = arith.constant 2 : index
    %c4_192 = arith.constant 4 : index
    %176 = vector.load %arg1[%c2_190, %c2_191, %c4_192] : memref<4x20x40xf32, #tpu.memory_space<vmem>>, vector<1x18x36xf32>
    %177 = vector.shape_cast %176 : vector<1x18x36xf32> to vector<18x36xf32>
    %c252_193 = arith.constant 252 : index
    %c0_194 = arith.constant 0 : index
    %178 = vector.load %arg2[%c252_193, %c0_194] : memref<324x36xf32, #tpu.memory_space<vmem>>, vector<36x36xf32>
    %cst_195 = arith.constant dense<0.000000e+00> : vector<18x36xf32>
    %179 = tpu.matmul %177, %178, %cst_195 {dimension_numbers = #tpu.dot_dimension_numbers<[1], [0], [0], [1], [0, 0, 1, 1], [], []>} : vector<18x36xf32>, vector<36x36xf32>, vector<18x36xf32> -> vector<18x36xf32>
    %180 = arith.addf %175, %179 : vector<18x36xf32>
    %c3_196 = arith.constant 3 : index
    %c2_197 = arith.constant 2 : index
    %c4_198 = arith.constant 4 : index
    %181 = vector.load %arg1[%c3_196, %c2_197, %c4_198] : memref<4x20x40xf32, #tpu.memory_space<vmem>>, vector<1x18x36xf32>
    %182 = vector.shape_cast %181 : vector<1x18x36xf32> to vector<18x36xf32>
    %c288_199 = arith.constant 288 : index
    %c0_200 = arith.constant 0 : index
    %183 = vector.load %arg2[%c288_199, %c0_200] : memref<324x36xf32, #tpu.memory_space<vmem>>, vector<36x36xf32>
    %cst_201 = arith.constant dense<0.000000e+00> : vector<18x36xf32>
    %184 = tpu.matmul %182, %183, %cst_201 {dimension_numbers = #tpu.dot_dimension_numbers<[1], [0], [0], [1], [0, 0, 1, 1], [], []>} : vector<18x36xf32>, vector<36x36xf32>, vector<18x36xf32> -> vector<18x36xf32>
    %185 = arith.addf %180, %184 : vector<18x36xf32>
    %186 = vector.extract_strided_slice %185 {offsets = [0, 0], sizes = [16, 32], strides = [1, 1]} : vector<18x36xf32> to vector<16x32xf32>
    %187 = arith.addf %139, %186 : vector<16x32xf32>
    %188 = arith.mulf %186, %186 : vector<16x32xf32>
    %189 = arith.addf %141, %188 : vector<16x32xf32>
    %c0_202 = arith.constant 0 : index
    %c0_203 = arith.constant 0 : index
    %190 = vector.load %arg4[%c0_202, %c0_203] : memref<35x32xf32, #tpu.memory_space<vmem>>, vector<32x32xf32>
    %c32 = arith.constant 32 : index
    %c0_204 = arith.constant 0 : index
    %191 = vector.load %arg4[%c32, %c0_204] : memref<35x32xf32, #tpu.memory_space<vmem>>, vector<1x32xf32>
    %c33 = arith.constant 33 : index
    %c0_205 = arith.constant 0 : index
    %192 = vector.load %arg4[%c33, %c0_205] : memref<35x32xf32, #tpu.memory_space<vmem>>, vector<1x32xf32>
    %c34 = arith.constant 34 : index
    %c0_206 = arith.constant 0 : index
    %193 = vector.load %arg4[%c34, %c0_206] : memref<35x32xf32, #tpu.memory_space<vmem>>, vector<1x3xf32>
    %cst_207 = arith.constant dense<0.000000e+00> : vector<32xf32>
    %194 = vector.multi_reduction <add>, %187, %cst_207 [0] : vector<16x32xf32> to vector<32xf32>
    %195 = vector.shape_cast %194 : vector<32xf32> to vector<1x32xf32>
    %cst_208 = arith.constant dense<0.000000e+00> : vector<32xf32>
    %196 = vector.multi_reduction <add>, %189, %cst_208 [0] : vector<16x32xf32> to vector<32xf32>
    %197 = vector.shape_cast %196 : vector<32xf32> to vector<1x32xf32>
    %cst_209 = arith.constant dense<0.000000e+00> : vector<1x32xf32>
    %198 = tpu.matmul %195, %190, %cst_209 {dimension_numbers = #tpu.dot_dimension_numbers<[1], [0], [0], [1], [0, 0, 1, 1], [], []>} : vector<1x32xf32>, vector<32x32xf32>, vector<1x32xf32> -> vector<1x32xf32>
    %cst_210 = arith.constant 0.001953125 : f32
    %199 = vector.broadcast %cst_210 : f32 to vector<1x32xf32>
    %200 = arith.mulf %198, %199 : vector<1x32xf32>
    %cst_211 = arith.constant dense<0.000000e+00> : vector<1x32xf32>
    %201 = tpu.matmul %197, %190, %cst_211 {dimension_numbers = #tpu.dot_dimension_numbers<[1], [0], [0], [1], [0, 0, 1, 1], [], []>} : vector<1x32xf32>, vector<32x32xf32>, vector<1x32xf32> -> vector<1x32xf32>
    %cst_212 = arith.constant 0.001953125 : f32
    %202 = vector.broadcast %cst_212 : f32 to vector<1x32xf32>
    %203 = arith.mulf %201, %202 : vector<1x32xf32>
    %204 = arith.mulf %200, %200 : vector<1x32xf32>
    %205 = arith.subf %203, %204 : vector<1x32xf32>
    %cst_213 = arith.constant 9.99999974E-6 : f32
    %206 = vector.broadcast %cst_213 : f32 to vector<1x32xf32>
    %207 = arith.addf %205, %206 : vector<1x32xf32>
    %208 = math.rsqrt %207 : vector<1x32xf32>
    %209 = arith.mulf %191, %208 : vector<1x32xf32>
    %210 = arith.mulf %200, %209 : vector<1x32xf32>
    %211 = arith.subf %192, %210 : vector<1x32xf32>
    %cst_214 = arith.constant 0.000000e+00 : f32
    %212 = vector.broadcast %cst_214 : f32 to vector<18x36xf32>
    %c0_215 = arith.constant 0 : index
    %c0_216 = arith.constant 0 : index
    %213 = vector.load %arg6[%c0_215, %c0_216] : memref<18x36xf32, #tpu.memory_space<vmem>>, vector<18x36xf32>
    tpu.vector_store %arg6[%c0_215, %c0_216], %212 {strides = array<i32>} : memref<18x36xf32, #tpu.memory_space<vmem>>, vector<18x36xf32>,
    %214 = vector.broadcast %209 : vector<1x32xf32> to vector<16x32xf32>
    %215 = arith.mulf %44, %214 : vector<16x32xf32>
    %216 = vector.broadcast %211 : vector<1x32xf32> to vector<16x32xf32>
    %217 = arith.addf %215, %216 : vector<16x32xf32>
    %cst_217 = arith.constant 0.000000e+00 : f32
    %218 = vector.broadcast %cst_217 : f32 to vector<16x32xf32>
    %219 = arith.maximumf %217, %218 : vector<16x32xf32>
    %c2_218 = arith.constant 2 : index
    %c4_219 = arith.constant 4 : index
    %220 = vector.load %arg6[%c2_218, %c4_219] : memref<18x36xf32, #tpu.memory_space<vmem>>, vector<16x32xf32>
    %221 = arith.maximumf %220, %219 : vector<16x32xf32>
    %c2_220 = arith.constant 2 : index
    %c4_221 = arith.constant 4 : index
    %222 = vector.load %arg6[%c2_220, %c4_221] : memref<18x36xf32, #tpu.memory_space<vmem>>, vector<16x32xf32>
    tpu.vector_store %arg6[%c2_220, %c4_221], %221 {strides = array<i32>} : memref<18x36xf32, #tpu.memory_space<vmem>>, vector<16x32xf32>,
    %223 = vector.broadcast %209 : vector<1x32xf32> to vector<16x32xf32>
    %224 = arith.mulf %90, %223 : vector<16x32xf32>
    %225 = vector.broadcast %211 : vector<1x32xf32> to vector<16x32xf32>
    %226 = arith.addf %224, %225 : vector<16x32xf32>
    %cst_222 = arith.constant 0.000000e+00 : f32
    %227 = vector.broadcast %cst_222 : f32 to vector<16x32xf32>
    %228 = arith.maximumf %226, %227 : vector<16x32xf32>
    %c2_223 = arith.constant 2 : index
    %c0_224 = arith.constant 0 : index
    %229 = vector.load %arg6[%c2_223, %c0_224] : memref<18x36xf32, #tpu.memory_space<vmem>>, vector<16x32xf32>
    %230 = arith.maximumf %229, %228 : vector<16x32xf32>
    %c2_225 = arith.constant 2 : index
    %c0_226 = arith.constant 0 : index
    %231 = vector.load %arg6[%c2_225, %c0_226] : memref<18x36xf32, #tpu.memory_space<vmem>>, vector<16x32xf32>
    tpu.vector_store %arg6[%c2_225, %c0_226], %230 {strides = array<i32>} : memref<18x36xf32, #tpu.memory_space<vmem>>, vector<16x32xf32>,
    %232 = vector.broadcast %209 : vector<1x32xf32> to vector<16x32xf32>
    %233 = arith.mulf %138, %232 : vector<16x32xf32>
    %234 = vector.broadcast %211 : vector<1x32xf32> to vector<16x32xf32>
    %235 = arith.addf %233, %234 : vector<16x32xf32>
    %cst_227 = arith.constant 0.000000e+00 : f32
    %236 = vector.broadcast %cst_227 : f32 to vector<16x32xf32>
    %237 = arith.maximumf %235, %236 : vector<16x32xf32>
    %c0_228 = arith.constant 0 : index
    %c4_229 = arith.constant 4 : index
    %238 = vector.load %arg6[%c0_228, %c4_229] : memref<18x36xf32, #tpu.memory_space<vmem>>, vector<16x32xf32>
    %239 = arith.maximumf %238, %237 : vector<16x32xf32>
    %c0_230 = arith.constant 0 : index
    %c4_231 = arith.constant 4 : index
    %240 = vector.load %arg6[%c0_230, %c4_231] : memref<18x36xf32, #tpu.memory_space<vmem>>, vector<16x32xf32>
    tpu.vector_store %arg6[%c0_230, %c4_231], %239 {strides = array<i32>} : memref<18x36xf32, #tpu.memory_space<vmem>>, vector<16x32xf32>,
    %241 = vector.broadcast %209 : vector<1x32xf32> to vector<16x32xf32>
    %242 = arith.mulf %186, %241 : vector<16x32xf32>
    %243 = vector.broadcast %211 : vector<1x32xf32> to vector<16x32xf32>
    %244 = arith.addf %242, %243 : vector<16x32xf32>
    %cst_232 = arith.constant 0.000000e+00 : f32
    %245 = vector.broadcast %cst_232 : f32 to vector<16x32xf32>
    %246 = arith.maximumf %244, %245 : vector<16x32xf32>
    %c0_233 = arith.constant 0 : index
    %c0_234 = arith.constant 0 : index
    %247 = vector.load %arg6[%c0_233, %c0_234] : memref<18x36xf32, #tpu.memory_space<vmem>>, vector<16x32xf32>
    %248 = arith.maximumf %247, %246 : vector<16x32xf32>
    %c0_235 = arith.constant 0 : index
    %c0_236 = arith.constant 0 : index
    %249 = vector.load %arg6[%c0_235, %c0_236] : memref<18x36xf32, #tpu.memory_space<vmem>>, vector<16x32xf32>
    tpu.vector_store %arg6[%c0_235, %c0_236], %248 {strides = array<i32>} : memref<18x36xf32, #tpu.memory_space<vmem>>, vector<16x32xf32>,
    %c0_237 = arith.constant 0 : index
    %c0_238 = arith.constant 0 : index
    %250 = vector.load %arg6[%c0_237, %c0_238] : memref<18x36xf32, #tpu.memory_space<vmem>>, vector<2x36xf32>
    %c0_239 = arith.constant 0 : index
    %c0_240 = arith.constant 0 : index
    %251 = vector.load %arg3[%c0_239, %c0_240] : memref<324x3xf32, #tpu.memory_space<vmem>>, vector<36x3xf32>
    %cst_241 = arith.constant dense<0.000000e+00> : vector<2x3xf32>
    %252 = tpu.matmul %250, %251, %cst_241 {dimension_numbers = #tpu.dot_dimension_numbers<[1], [0], [0], [1], [0, 0, 1, 1], [], []>} : vector<2x36xf32>, vector<36x3xf32>, vector<2x3xf32> -> vector<2x3xf32>
    %c2_242 = arith.constant 2 : index
    %c0_243 = arith.constant 0 : index
    %253 = vector.load %arg6[%c2_242, %c0_243] : memref<18x36xf32, #tpu.memory_space<vmem>>, vector<2x36xf32>
    %c36_244 = arith.constant 36 : index
    %c0_245 = arith.constant 0 : index
    %254 = vector.load %arg3[%c36_244, %c0_245] : memref<324x3xf32, #tpu.memory_space<vmem>>, vector<36x3xf32>
    %cst_246 = arith.constant dense<0.000000e+00> : vector<2x3xf32>
    %255 = tpu.matmul %253, %254, %cst_246 {dimension_numbers = #tpu.dot_dimension_numbers<[1], [0], [0], [1], [0, 0, 1, 1], [], []>} : vector<2x36xf32>, vector<36x3xf32>, vector<2x3xf32> -> vector<2x3xf32>
    %256 = arith.addf %252, %255 : vector<2x3xf32>
    %c4_247 = arith.constant 4 : index
    %c0_248 = arith.constant 0 : index
    %257 = vector.load %arg6[%c4_247, %c0_248] : memref<18x36xf32, #tpu.memory_space<vmem>>, vector<2x36xf32>
    %c72_249 = arith.constant 72 : index
    %c0_250 = arith.constant 0 : index
    %258 = vector.load %arg3[%c72_249, %c0_250] : memref<324x3xf32, #tpu.memory_space<vmem>>, vector<36x3xf32>
    %cst_251 = arith.constant dense<0.000000e+00> : vector<2x3xf32>
    %259 = tpu.matmul %257, %258, %cst_251 {dimension_numbers = #tpu.dot_dimension_numbers<[1], [0], [0], [1], [0, 0, 1, 1], [], []>} : vector<2x36xf32>, vector<36x3xf32>, vector<2x3xf32> -> vector<2x3xf32>
    %260 = arith.addf %256, %259 : vector<2x3xf32>
    %c6 = arith.constant 6 : index
    %c0_252 = arith.constant 0 : index
    %261 = vector.load %arg6[%c6, %c0_252] : memref<18x36xf32, #tpu.memory_space<vmem>>, vector<2x36xf32>
    %c108_253 = arith.constant 108 : index
    %c0_254 = arith.constant 0 : index
    %262 = vector.load %arg3[%c108_253, %c0_254] : memref<324x3xf32, #tpu.memory_space<vmem>>, vector<36x3xf32>
    %cst_255 = arith.constant dense<0.000000e+00> : vector<2x3xf32>
    %263 = tpu.matmul %261, %262, %cst_255 {dimension_numbers = #tpu.dot_dimension_numbers<[1], [0], [0], [1], [0, 0, 1, 1], [], []>} : vector<2x36xf32>, vector<36x3xf32>, vector<2x3xf32> -> vector<2x3xf32>
    %264 = arith.addf %260, %263 : vector<2x3xf32>
    %c8 = arith.constant 8 : index
    %c0_256 = arith.constant 0 : index
    %265 = vector.load %arg6[%c8, %c0_256] : memref<18x36xf32, #tpu.memory_space<vmem>>, vector<2x36xf32>
    %c144_257 = arith.constant 144 : index
    %c0_258 = arith.constant 0 : index
    %266 = vector.load %arg3[%c144_257, %c0_258] : memref<324x3xf32, #tpu.memory_space<vmem>>, vector<36x3xf32>
    %cst_259 = arith.constant dense<0.000000e+00> : vector<2x3xf32>
    %267 = tpu.matmul %265, %266, %cst_259 {dimension_numbers = #tpu.dot_dimension_numbers<[1], [0], [0], [1], [0, 0, 1, 1], [], []>} : vector<2x36xf32>, vector<36x3xf32>, vector<2x3xf32> -> vector<2x3xf32>
    %268 = arith.addf %264, %267 : vector<2x3xf32>
    %c10 = arith.constant 10 : index
    %c0_260 = arith.constant 0 : index
    %269 = vector.load %arg6[%c10, %c0_260] : memref<18x36xf32, #tpu.memory_space<vmem>>, vector<2x36xf32>
    %c180_261 = arith.constant 180 : index
    %c0_262 = arith.constant 0 : index
    %270 = vector.load %arg3[%c180_261, %c0_262] : memref<324x3xf32, #tpu.memory_space<vmem>>, vector<36x3xf32>
    %cst_263 = arith.constant dense<0.000000e+00> : vector<2x3xf32>
    %271 = tpu.matmul %269, %270, %cst_263 {dimension_numbers = #tpu.dot_dimension_numbers<[1], [0], [0], [1], [0, 0, 1, 1], [], []>} : vector<2x36xf32>, vector<36x3xf32>, vector<2x3xf32> -> vector<2x3xf32>
    %272 = arith.addf %268, %271 : vector<2x3xf32>
    %c12 = arith.constant 12 : index
    %c0_264 = arith.constant 0 : index
    %273 = vector.load %arg6[%c12, %c0_264] : memref<18x36xf32, #tpu.memory_space<vmem>>, vector<2x36xf32>
    %c216_265 = arith.constant 216 : index
    %c0_266 = arith.constant 0 : index
    %274 = vector.load %arg3[%c216_265, %c0_266] : memref<324x3xf32, #tpu.memory_space<vmem>>, vector<36x3xf32>
    %cst_267 = arith.constant dense<0.000000e+00> : vector<2x3xf32>
    %275 = tpu.matmul %273, %274, %cst_267 {dimension_numbers = #tpu.dot_dimension_numbers<[1], [0], [0], [1], [0, 0, 1, 1], [], []>} : vector<2x36xf32>, vector<36x3xf32>, vector<2x3xf32> -> vector<2x3xf32>
    %276 = arith.addf %272, %275 : vector<2x3xf32>
    %c14 = arith.constant 14 : index
    %c0_268 = arith.constant 0 : index
    %277 = vector.load %arg6[%c14, %c0_268] : memref<18x36xf32, #tpu.memory_space<vmem>>, vector<2x36xf32>
    %c252_269 = arith.constant 252 : index
    %c0_270 = arith.constant 0 : index
    %278 = vector.load %arg3[%c252_269, %c0_270] : memref<324x3xf32, #tpu.memory_space<vmem>>, vector<36x3xf32>
    %cst_271 = arith.constant dense<0.000000e+00> : vector<2x3xf32>
    %279 = tpu.matmul %277, %278, %cst_271 {dimension_numbers = #tpu.dot_dimension_numbers<[1], [0], [0], [1], [0, 0, 1, 1], [], []>} : vector<2x36xf32>, vector<36x3xf32>, vector<2x3xf32> -> vector<2x3xf32>
    %280 = arith.addf %276, %279 : vector<2x3xf32>
    %c16 = arith.constant 16 : index
    %c0_272 = arith.constant 0 : index
    %281 = vector.load %arg6[%c16, %c0_272] : memref<18x36xf32, #tpu.memory_space<vmem>>, vector<2x36xf32>
    %c288_273 = arith.constant 288 : index
    %c0_274 = arith.constant 0 : index
    %282 = vector.load %arg3[%c288_273, %c0_274] : memref<324x3xf32, #tpu.memory_space<vmem>>, vector<36x3xf32>
    %cst_275 = arith.constant dense<0.000000e+00> : vector<2x3xf32>
    %283 = tpu.matmul %281, %282, %cst_275 {dimension_numbers = #tpu.dot_dimension_numbers<[1], [0], [0], [1], [0, 0, 1, 1], [], []>} : vector<2x36xf32>, vector<36x3xf32>, vector<2x3xf32> -> vector<2x3xf32>
    %284 = arith.addf %280, %283 : vector<2x3xf32>
    %285 = vector.broadcast %193 : vector<1x3xf32> to vector<2x3xf32>
    %286 = arith.addf %284, %285 : vector<2x3xf32>
    %cst_276 = arith.constant dense<0xFF800000> : vector<2xf32>
    %287 = vector.multi_reduction <maximumf>, %286, %cst_276 [1] : vector<2x3xf32> to vector<2xf32>
    %288 = vector.shape_cast %287 : vector<2xf32> to vector<2x1xf32>
    %289 = vector.broadcast %288 : vector<2x1xf32> to vector<2x3xf32>
    %290 = arith.subf %286, %289 : vector<2x3xf32>
    %291 = math.exp %290 : vector<2x3xf32>
    %cst_277 = arith.constant dense<0.000000e+00> : vector<2xf32>
    %292 = vector.multi_reduction <add>, %291, %cst_277 [1] : vector<2x3xf32> to vector<2xf32>
    %293 = vector.shape_cast %292 : vector<2xf32> to vector<2x1xf32>
    %294 = vector.broadcast %293 : vector<2x1xf32> to vector<2x3xf32>
    %295 = arith.divf %291, %294 : vector<2x3xf32>
    %c0_278 = arith.constant 0 : index
    %c0_279 = arith.constant 0 : index
    %296 = vector.load %arg5[%c0_278, %c0_279] : memref<2x3xf32, #tpu.memory_space<vmem>>, vector<2x3xf32>
    tpu.vector_store %arg5[%c0_278, %c0_279], %295 {strides = array<i32>} : memref<2x3xf32, #tpu.memory_space<vmem>>, vector<2x3xf32>,
    return
  }
  func.func @transform_0(%arg0: i32) -> (i32, i32, i32) {
    %c0_i32 = arith.constant 0 : i32
    %c0_i32_0 = arith.constant 0 : i32
    %c0_i32_1 = arith.constant 0 : i32
    %c0_i32_2 = arith.constant 0 : i32
    return %c0_i32, %c0_i32_0, %c0_i32_1 : i32, i32, i32
  }
  func.func @transform_1(%arg0: i32) -> (i32, i32) {
    %c0_i32 = arith.constant 0 : i32
    %c0_i32_0 = arith.constant 0 : i32
    %c0_i32_1 = arith.constant 0 : i32
    return %c0_i32, %c0_i32_0 : i32, i32
  }
  func.func @transform_2(%arg0: i32) -> (i32, i32) {
    %c0_i32 = arith.constant 0 : i32
    %c0_i32_0 = arith.constant 0 : i32
    %c0_i32_1 = arith.constant 0 : i32
    return %c0_i32, %c0_i32_0 : i32, i32
  }
  func.func @transform_3(%arg0: i32) -> (i32, i32) {
    %c0_i32 = arith.constant 0 : i32
    %c0_i32_0 = arith.constant 0 : i32
    %c0_i32_1 = arith.constant 0 : i32
    return %c0_i32, %c0_i32_0 : i32, i32
  }
  func.func @transform_4(%arg0: i32) -> (i32, i32) {
    %c0_i32 = arith.constant 0 : i32
    %c0_i32_0 = arith.constant 0 : i32
    %c0_i32_1 = arith.constant 0 : i32
    return %c0_i32, %c0_i32_0 : i32, i32
  }
}

</mosaic_0001>

<bundles_post_ra>
// kernel: net_forward.1
= control target key start
LH: loop header
LB: loop body
LE: loop exit
PB: predicated region body
PF: predicated region fallthrough
CT: control target
= control target key end

     0   :  { %s6230_s19 = smov 124   ;;  %vm35_vm0 = vcmask 293888   ;;  %v6231_v4 = vmov 0.0|0.0   ;;  %vm6232_vm1 = vmmov 0   ;;  %v6233_v5 = vmov 0.0   ;;  %s7670_s0 = inlined_call_operand.vmem [shape: f32[4,20,40], index: 0, kind: input, shape index: {}]   ;;  %s7671_s1 = inlined_call_operand.vmem [shape: f32[324,36], index: 1, kind: input, shape index: {}]   ;;  %s7672_s2 = inlined_call_operand.vmem [shape: f32[324,3], index: 2, kind: input, shape index: {}]   ;;  %s7673_s3 = inlined_call_operand.vmem [shape: f32[35,32], index: 3, kind: input, shape index: {}]   ;;  %s7674_s4 = inlined_call_operand.hbm [shape: f32[2,3], index: 4, kind: output, shape index: {}]  }
   0x1   :  { %v6264_v0 = vld [vmem:[%s7670_s0] sm:$0xff]  ;;  %v6269_v1 = vld [vmem:[%s7670_s0 + $0x10] sm:$0x3]  ;;  %v6278_v2 = vld [vmem:[%s7670_s0 + $0x8] sm:$0xff]  ;;  %5752 = vmatprep.subr.bf16.mxu0 %v6231_v4  ;;  %4939 = vmatprep.mubr.msk.f32.mxu0 %vm6232_vm1, %v6233_v5  ;;  %3523 = vst.msk [vmem:[#allocation2] sm:$0xff] %vm35_vm0, %v6233_v5  ;;  %vm45_vm2 = vcmask 1043456  }
   0x2   :  { %226 = vrot.lane.b32.xlu0 %v6264_v0, %s6230_s19  ;;  %230 = vrot.lane.b32.xlu1 %v6269_v1, %s6230_s19  ;;  %v6283_v3 = vld [vmem:[%s7670_s0 + $0x18] sm:$0xff]  ;;  %3524 = vst.msk [vmem:[#allocation2 + $0x8] sm:$0xff] %vm35_vm0, %v6233_v5  ;;  %v30_v6 = vld [vmem:[%s7671_s1 + $0x24] sm:$0xff] }
   0x3   :  { %5806 = vmatprep.subr.bf16.mxu1 %v6231_v4  ;;  %5110 = vmatprep.mubr.msk.f32.mxu1 %vm6232_vm1, %v6233_v5  ;;  %v6305_v7 = vld [vmem:[%s7670_s0 + $0x20] sm:$0xff]  ;;  %v6310_v8 = vld [vmem:[%s7670_s0 + $0x28] sm:$0x3]  ;;  %v31_v9 = vld [vmem:[%s7671_s1 + $0x2c] sm:$0xff] }
   0x4   :  { %v6315_v10 = vpack.c.bf16 %v31_v9, %v30_v6  ;;  %v32_v11 = vld [vmem:[%s7671_s1 + $0x34] sm:$0xff]  ;;  %v33_v12 = vld [vmem:[%s7671_s1 + $0x3c] sm:$0xff]  ;;  %v22_v17 = vld [vmem:[%s7671_s1 + $0x8] sm:$0xff] }
   0x5   :  { %v6330_v13 = vld [vmem:[%s7670_s0 + $0x30] sm:$0xff]  ;;  %v6335_v14 = vld [vmem:[%s7670_s0 + $0x38] sm:$0xff]  ;;  %v6338_v15 = vpack.c.bf16 %v33_v12, %v32_v11  ;;  %v21_v16 = vld [vmem:[%s7671_s1] sm:$0xff] }
   0x6   :  { %228 = vrot.lane.b32.xlu0 %v6278_v2, %s6230_s19  ;;  %1107 = vrot.lane.b32.xlu1 %v6283_v3, %s6230_s19  ;;  %v6356_v18 = vld [vmem:[%s7670_s0 + $0x40] sm:$0x3]  ;;  %v6361_v19 = vld [vmem:[%s7670_s0 + $0x48] sm:$0xff]  ;;  %v6372_v21 = vpack.c.bf16 %v22_v17, %v21_v16 }
   0x7   :  { %5754 = vmatpush3.bf16.msra.mxu0 %v6315_v10  ;;  %5808 = vmatpush3.bf16.msra.mxu1 %v6315_v10  ;;  %v6369_v20 = vld [vmem:[%s7671_s1 + $0x44] sm:$0xf]  ;;  %v23_v22 = vld [vmem:[%s7671_s1 + $0x10] sm:$0xff]  ;;  %v24_v23 = vld [vmem:[%s7671_s1 + $0x18] sm:$0xff] }
   0x8   :  { %5755 = vmatprep.subr.bf16.mxu0 %v6231_v4  ;;  %5809 = vmatprep.subr.bf16.mxu1 %v6231_v4 }
   0xa   :  { %1109 = vrot.lane.b32.xlu0 %v6305_v7, %s6230_s19  ;;  %1111 = vrot.lane.b32.xlu1 %v6310_v8, %s6230_s19 }
   0xb   :  { %5757 = vmatpush3.bf16.msra.mxu0 %v6338_v15  ;;  %5811 = vmatpush3.bf16.msra.mxu1 %v6338_v15 }
   0xc   :  { %4937 = vmatprep.subr.mxu0 %v6233_v5  ;;  %5108 = vmatprep.subr.mxu1 %v6233_v5 }
   0xe   :  { %537 = vrot.lane.b32.xlu0 %v6330_v13, %s6230_s19  ;;  %539 = vrot.lane.b32.xlu1 %v6335_v14, %s6230_s19 }
  0x12   :  { %541 = vrot.lane.b32.xlu0 %v6356_v18, %s6230_s19  ;;  %1368 = vrot.lane.b32.xlu1 %v6361_v19, %s6230_s19 }
  0x13   :  { %9 = vsyncpa [#allocation4], 0  ;;  %v6387_v24 = vld [vmem:[%s7670_s0 + $0x50] sm:$0xff]  ;;  %v6392_v25 = vld [vmem:[%s7670_s0 + $0x58] sm:$0x3]  ;;  %4938 = vmatpush3.msk.msra.mxu0 %vm45_vm2, %v6369_v20  ;;  %5109 = vmatpush3.msk.msra.mxu1 %vm45_vm2, %v6369_v20  ;;  %v6404_v26 = vpack.c.bf16 %v24_v23, %v23_v22  ;;  %vm2520_vm3 = vcmask 1041408  }
  0x14   :  { %4940 = vmatmul.mubr.msk.f32.vlgmr.msra.gmra.mrb[0].mxu0 %vm35_vm0, %v6283_v3  ;;  %5758 = vmatprep.subr.bf16.mxu0 %v6231_v4  ;;  %v6413_v27 = vld [vmem:[%s7670_s0 + $0x2] sm:$0xff]  ;;  %v6418_v28 = vld [vmem:[%s7670_s0 + $0xa] sm:$0xff]  ;;  %v6445_v32 = vld [vmem:[%s7670_s0 + $0x12] sm:$0x3]  ;;  %vm3326_vm4 = vcmask 1045504   ;;  %vm3334_vm5 = vcmask 293920  }
  0x15   :  { %4942 = vmatprep.mubr.msk.f32.mxu0 %vm6232_vm1, %v6233_v5  ;;  %5760 = vmatpush3.bf16.msra.mxu0 %v6372_v21  ;;  %v6430_v29 = vld [vmem:[%s7671_s1 + $0x20] sm:$0xf]  ;;  %v221_v30 = vld [vmem:[%s7671_s1 + $0x48] sm:$0xff]  ;;  %v222_v31 = vld [vmem:[%s7671_s1 + $0x50] sm:$0xff]  ;;  %vm3366_vm6 = vcmask 261120   ;;  %vm3525_vm7 = vcmask 287744  }
  0x16   :  { %1370 = vrot.lane.b32.xlu0 %v6387_v24, %s6230_s19  ;;  %1372 = vrot.lane.b32.xlu1 %v6392_v25, %s6230_s19  ;;  %v6450_v33 = vld [vmem:[%s7670_s0 + $0x1a] sm:$0xff]  ;;  %v6459_v34 = vpack.c.bf16 %v222_v31, %v221_v30  ;;  %v6474_v37 = vld [vmem:[%s7670_s0 + $0x22] sm:$0xff]  ;;  %3526 = vst.msk [vmem:[#allocation2 + $0x10] sm:$0x3] %vm3525_vm7, %v6233_v5  ;;  %vm4367_vm8 = vcmask 17408   ;;  %s6235_s21 = smov [#allocation3]  }
  0x17   :  { %5761 = vmatprep.subr.bf16.mxu0 %v6231_v4  ;;  %5812 = vmatprep.subr.bf16.mxu1 %v6231_v4  ;;  %v223_v35 = vld [vmem:[%s7671_s1 + $0x58] sm:$0xff]  ;;  %v224_v36 = vld [vmem:[%s7671_s1 + $0x60] sm:$0xff]  ;;  %v6479_v38 = vld [vmem:[%s7670_s0 + $0x2a] sm:$0x3]  ;;  %s4386_s22 = sshll.u32 %s6235_s21, 4  ;;  %s4387_s22 = int_to_ptr.vmem [resolvable:$true] %s4386_s22 }
  0x18   :  { %4943 = vmatmul.mubr.msk.f32.gmra.mrb[2].mxu0 %vm35_vm0, %v6305_v7  ;;  %v6487_v39 = vpack.c.bf16 %v224_v36, %v223_v35  ;;  %v6503_v40 = vld [vmem:[%s7671_s1 + $0x68] sm:$0xf]  ;;  %v6515_v41 = vld [vmem:[%s7670_s0 + $0x32] sm:$0xff]  ;;  %v6522_v42 = vld [vmem:[%s7670_s0 + $0x3a] sm:$0xff]  ;;  %p6211_p1 = scmp.lt.s32.totalorder %s4387_s22, %s4387_s22 }
  0x19   :  { %4945 = vmatprep.mubr.msk.f32.mxu0 %vm6232_vm1, %v6233_v5  ;;  %5763 = vmatpush3.bf16.msra.mxu0 %v6404_v26  ;;  %v6529_v43 = vld [vmem:[%s7670_s0 + $0x42] sm:$0x3]  ;;  %v6536_v44 = vld [vmem:[%s7670_s0 + $0x4a] sm:$0xff]  ;;  %v6543_v45 = vld [vmem:[%s7670_s0 + $0x52] sm:$0xff] }
  0x1a   :  { %846 = vrot.lane.b32.xlu0 %v6413_v27, %s6230_s19  ;;  %848 = vrot.lane.b32.xlu1 %v6418_v28, %s6230_s19  ;;  %v328_v46 = vld [vmem:[%s7671_s1 + $0x6c] sm:$0xff]  ;;  %v329_v47 = vld [vmem:[%s7671_s1 + $0x74] sm:$0xff] }
  0x1b   :  { %4956 = vmatprep.subr.mxu0 %v6233_v5  ;;  %v6553_v49 = vpack.c.bf16 %v329_v47, %v328_v46  ;;  %v330_v50 = vld [vmem:[%s7671_s1 + $0x7c] sm:$0xff]  ;;  %v331_v51 = vld [vmem:[%s7671_s1 + $0x84] sm:$0xff]  ;;  %v432_v55 = vld [vmem:[%s7671_s1 + $0x90] sm:$0xff] }
  0x1c   :  { %4946 = vmatmul.mubr.msk.f32.gmra.mrb[4].mxu0 %vm35_vm0, %v6310_v8  ;;  %v6570_v53 = vpack.c.bf16 %v331_v51, %v330_v50  ;;  %v433_v56 = vld [vmem:[%s7671_s1 + $0x98] sm:$0xff]  ;;  %v6593_v57 = vld [vmem:[%s7671_s1 + $0x8c] sm:$0xf]  ;;  %v434_v59 = vld [vmem:[%s7671_s1 + $0xa0] sm:$0xff] }
  0x1d   :  { %4957 = vmatpush3.msk.msra.mxu0 %vm45_vm2, %v6430_v29  ;;  %4958 = vmatprep.mubr.msk.f32.mxu0 %vm6232_vm1, %v6233_v5  ;;  %v6602_v58 = vpack.c.bf16 %v433_v56, %v432_v55  ;;  %v435_v60 = vld [vmem:[%s7671_s1 + $0xa8] sm:$0xff]  ;;  %v6642_v62 = vld [vmem:[%s7671_s1 + $0xb0] sm:$0xf]  ;;  %v532_v63 = vld [vmem:[%s7671_s1 + $0xb4] sm:$0xff] }
  0x1e   :  { %850 = vrot.lane.b32.xlu0 %v6445_v32, %s6230_s19  ;;  %1629 = vrot.lane.b32.xlu1 %v6450_v33, %s6230_s19  ;;  %v6622_v61 = vpack.c.bf16 %v435_v60, %v434_v59  ;;  %v535_v6 = vld [vmem:[%s7671_s1 + $0xcc] sm:$0xff]  ;;  %v638_v11 = vld [vmem:[%s7671_s1 + $0xd8] sm:$0xff] }
  0x1f   :  { %5764 = vmatprep.subr.bf16.mxu0 %v6231_v4  ;;  %v639_v12 = vld [vmem:[%s7671_s1 + $0xe0] sm:$0xff]  ;;  %v6708_v16 = vld [vmem:[%s7671_s1 + $0xd4] sm:$0xf]  ;;  %v640_v23 = vld [vmem:[%s7671_s1 + $0xe8] sm:$0xff] }
  0x20   :  { %4959 = vmatmul.mubr.msk.f32.vlgmr.msra.gmra.mrb[0].mxu0 %vm35_vm0, %v6264_v0  ;;  %v533_v0 = vld [vmem:[%s7671_s1 + $0xbc] sm:$0xff]  ;;  %v6718_v22 = vpack.c.bf16 %v639_v12, %v638_v11  ;;  %v641_v30 = vld [vmem:[%s7671_s1 + $0xf0] sm:$0xff]  ;;  %v742_v47 = vld [vmem:[%s7671_s1 + $0x104] sm:$0xff] }
  0x21   :  { %4961 = vmatprep.mubr.msk.f32.mxu0 %vm6232_vm1, %v6233_v5  ;;  %5766 = vmatpush3.bf16.msra.mxu0 %v6459_v34  ;;  %v6744_v35 = vpack.c.bf16 %v641_v30, %v640_v23  ;;  %v741_v46 = vld [vmem:[%s7671_s1 + $0xfc] sm:$0xff]  ;;  %v743_v51 = vld [vmem:[%s7671_s1 + $0x10c] sm:$0xff] }
  0x22   :  { %1631 = vrot.lane.b32.xlu0 %v6474_v37, %s6230_s19  ;;  %1633 = vrot.lane.b32.xlu1 %v6479_v38, %s6230_s19  ;;  %v6782_v50 = vpack.c.bf16 %v742_v47, %v741_v46  ;;  %v6822_v55 = vld [vmem:[%s7671_s1 + $0x11c] sm:$0xf]  ;;  %v841_v56 = vld [vmem:[%s7671_s1 + $0x120] sm:$0xff] }
  0x23   :  { %5767 = vmatprep.subr.bf16.mxu0 %v6231_v4  ;;  %v842_v59 = vld [vmem:[%s7671_s1 + $0x128] sm:$0xff] }
  0x24   :  { %4962 = vmatmul.mubr.msk.f32.gmra.mrb[2].mxu0 %vm35_vm0, %v6278_v2  ;;  %v6664_v2 = vpack.c.bf16 %v533_v0, %v532_v63  ;;  %v6846_v63 = vpack.c.bf16 %v842_v59, %v841_v56  ;;  %v843_v0 = vld [vmem:[%s7671_s1 + $0x130] sm:$0xff] }
  0x25   :  { %4964 = vmatprep.mubr.msk.f32.mxu0 %vm6232_vm1, %v6233_v5  ;;  %5769 = vmatpush3.bf16.msra.mxu0 %v6487_v39 }
  0x26   :  { %4975 = vmatprep.subr.mxu0 %v6233_v5  ;;  %2425 = vrot.lane.b32.xlu0 %v6515_v41, %s6230_s19 }
  0x27   :  { %2427 = vrot.lane.b32.xlu1 %v6522_v42, %s6230_s19 }
  0x28   :  { %4965 = vmatmul.mubr.msk.f32.gmra.mrb[4].mxu0 %vm35_vm0, %v6269_v1 }
  0x29   :  { %4976 = vmatpush3.msk.msra.mxu0 %vm45_vm2, %v6503_v40  ;;  %4977 = vmatprep.mubr.msk.f32.mxu0 %vm6232_vm1, %v6233_v5 }
  0x2a   :  { %5770 = vmatprep.subr.bf16.mxu0 %v6231_v4  ;;  %2429 = vrot.lane.b32.xlu0 %v6529_v43, %s6230_s19 }
  0x2b   :  { %3187 = vrot.lane.b32.xlu1 %v6536_v44, %s6230_s19 }
  0x2e   :  { %3189 = vrot.lane.b32.xlu0 %v6543_v45, %s6230_s19 }
  0x74   :  { %v227_v48 = vpop.permute.xlu0 %226  ;;  %v231_v54 = vpop.permute.xlu1 %230 }
  0x75   :  { %4978 = vmatmul.mubr.msk.f32.vlgmr.msra.gmra.mrb[0].mxu0 %vm35_vm0, %v227_v48  ;;  %5111 = vmatmul.mubr.msk.f32.vlgmr.msra.gmra.mrb[0].mxu1 %vm35_vm0, %v227_v48  ;;  %v6773_v48 = vld [vmem:[%s7671_s1 + $0xf8] sm:$0xf] }
  0x76   :  { %5814 = vmatpush3.bf16.msra.mxu1 %v6372_v21  ;;  %5113 = vmatprep.mubr.msk.f32.mxu1 %vm6232_vm1, %v6233_v5 }
  0x77   :  { %5815 = vmatprep.subr.bf16.mxu1 %v6231_v4  ;;  %4980 = vmatprep.mubr.msk.f32.mxu0 %vm6232_vm1, %v6233_v5 }
  0x78   :  { %v229_v52 = vpop.permute.xlu0 %228  ;;  %5772 = vmatpush3.bf16.msra.mxu0 %v6553_v49  ;;  %v1108_v1 = vpop.permute.xlu1 %1107 }
  0x79   :  { %4981 = vmatmul.mubr.msk.f32.gmra.mrb[2].mxu0 %vm35_vm0, %v229_v52  ;;  %5114 = vmatmul.mubr.msk.f32.gmra.mrb[2].mxu1 %vm35_vm0, %v229_v52  ;;  %v744_v52 = vld [vmem:[%s7671_s1 + $0x114] sm:$0xff] }
  0x7a   :  { %5817 = vmatpush3.bf16.msra.mxu1 %v6404_v26  ;;  %5773 = vmatprep.subr.bf16.mxu0 %v6231_v4 }
  0x7b   :  { %4983 = vmatprep.mubr.msk.f32.mxu0 %vm6232_vm1, %v6233_v5  ;;  %5116 = vmatprep.mubr.msk.f32.mxu1 %vm6232_vm1, %v6233_v5 }
  0x7c   :  { %5775 = vmatpush3.bf16.msra.mxu0 %v6570_v53  ;;  %5127 = vmatprep.subr.mxu1 %v6233_v5  ;;  %v1112_v9 = vpop.permute.xlu1 %1111 }
  0x7d   :  { %4984 = vmatmul.mubr.msk.f32.gmra.mrb[4].mxu0 %vm35_vm0, %v231_v54  ;;  %5117 = vmatmul.mubr.msk.f32.gmra.mrb[4].mxu1 %vm35_vm0, %v231_v54  ;;  %v6802_v54 = vpack.c.bf16 %v744_v52, %v743_v51 }
  0x7e   :  { %5128 = vmatpush3.msk.msra.mxu1 %vm45_vm2, %v6430_v29  ;;  %4994 = vmatprep.subr.mxu0 %v6233_v5 }
  0x7f   :  { %4996 = vmatprep.mubr.msk.f32.mxu0 %vm6232_vm1, %v6233_v5  ;;  %5129 = vmatprep.mubr.msk.f32.mxu1 %vm6232_vm1, %v6233_v5 }
  0x80   :  { %4995 = vmatpush3.msk.msra.mxu0 %vm45_vm2, %v6593_v57  ;;  %5818 = vmatprep.subr.bf16.mxu1 %v6231_v4  ;;  %v6736_v31 = vpop.permute.xlu1 %539 }
  0x81   :  { %4997 = vmatmul.mubr.msk.f32.vlgmr.msra.gmra.mrb[0].mxu0 %vm35_vm0, %v6330_v13  ;;  %5130 = vmatmul.mubr.msk.f32.vlgmr.msra.gmra.mrb[0].mxu1 %vm35_vm0, %v6283_v3  ;;  %v534_v3 = vld [vmem:[%s7671_s1 + $0xc4] sm:$0xff] }
  0x82   :  { %5820 = vmatpush3.bf16.msra.mxu1 %v6459_v34  ;;  %5776 = vmatprep.subr.bf16.mxu0 %v6231_v4 }
  0x83   :  { %4999 = vmatprep.mubr.msk.f32.mxu0 %vm6232_vm1, %v6233_v5  ;;  %5778 = vmatpush3.bf16.msra.mxu0 %v6602_v58 }
  0x84   :  { %5132 = vmatprep.mubr.msk.f32.mxu1 %vm6232_vm1, %v6233_v5  ;;  %5821 = vmatprep.subr.bf16.mxu1 %v6231_v4  ;;  %v6837_v60 = vpop.permute.xlu1 %1368 }
  0x85   :  { %5000 = vmatmul.mubr.msk.f32.gmra.mrb[2].mxu0 %vm35_vm0, %v6335_v14  ;;  %5133 = vmatmul.mubr.msk.f32.gmra.mrb[2].mxu1 %vm35_vm0, %v6305_v7  ;;  %v1110_v7 = vpop.permute.xlu0 %1109 }
  0x86   :  { %5823 = vmatpush3.bf16.msra.mxu1 %v6487_v39  ;;  %5779 = vmatprep.subr.bf16.mxu0 %v6231_v4 }
  0x87   :  { %5002 = vmatprep.mubr.msk.f32.mxu0 %vm6232_vm1, %v6233_v5  ;;  %5781 = vmatpush3.bf16.msra.mxu0 %v6622_v61 }
  0x88   :  { %5135 = vmatprep.mubr.msk.f32.mxu1 %vm6232_vm1, %v6233_v5  ;;  %5146 = vmatprep.subr.mxu1 %v6233_v5 }
  0x89   :  { %5003 = vmatmul.mubr.msk.f32.gmra.mrb[4].mxu0 %vm35_vm0, %v6356_v18  ;;  %5136 = vmatmul.mubr.msk.f32.gmra.mrb[4].mxu1 %vm35_vm0, %v6310_v8  ;;  %v6683_v8 = vpack.c.bf16 %v535_v6, %v534_v3  ;;  %v6713_v17 = vpop.permute.xlu0 %537 }
  0x8a   :  { %5147 = vmatpush3.msk.msra.mxu1 %vm45_vm2, %v6503_v40  ;;  %5013 = vmatprep.subr.mxu0 %v6233_v5 }
  0x8b   :  { %5014 = vmatpush3.msk.msra.mxu0 %vm45_vm2, %v6642_v62  ;;  %5015 = vmatprep.mubr.msk.f32.mxu0 %vm6232_vm1, %v6233_v5 }
  0x8c   :  { %5148 = vmatprep.mubr.msk.f32.mxu1 %vm6232_vm1, %v6233_v5  ;;  %5824 = vmatprep.subr.bf16.mxu1 %v6231_v4 }
  0x8d   :  { %5016 = vmatmul.mubr.msk.f32.vlgmr.msra.gmra.mrb[0].mxu0 %vm35_vm0, %v6361_v19  ;;  %5149 = vmatmul.mubr.msk.f32.vlgmr.msra.gmra.mrb[0].mxu1 %vm35_vm0, %v1108_v1  ;;  %v6752_v36 = vpop.permute.xlu0 %541  ;;  %v844_v1 = vld [vmem:[%s7671_s1 + $0x138] sm:$0xff] }
  0x8e   :  { %5826 = vmatpush3.bf16.msra.mxu1 %v6553_v49  ;;  %5782 = vmatprep.subr.bf16.mxu0 %v6231_v4  ;;  %v6868_v6 = vpack.c.bf16 %v844_v1, %v843_v0 }
  0x8f   :  { %5151 = vmatprep.mubr.msk.f32.mxu1 %vm6232_vm1, %v6233_v5  ;;  %5827 = vmatprep.subr.bf16.mxu1 %v6231_v4 }
  0x90   :  { %5018 = vmatprep.mubr.msk.f32.mxu0 %vm6232_vm1, %v6233_v5  ;;  %5784 = vmatpush3.bf16.msra.mxu0 %v6664_v2 }
  0x91   :  { %5019 = vmatmul.mubr.msk.f32.gmra.mrb[2].mxu0 %vm35_vm0, %v6387_v24  ;;  %5152 = vmatmul.mubr.msk.f32.gmra.mrb[2].mxu1 %vm35_vm0, %v1110_v7  ;;  %v6860_v3 = vpop.permute.xlu0 %1370  ;;  %v6876_v7 = vpop.permute.xlu1 %1372 }
  0x92   :  { %5829 = vmatpush3.bf16.msra.mxu1 %v6570_v53  ;;  %5785 = vmatprep.subr.bf16.mxu0 %v6231_v4 }
  0x93   :  { %5021 = vmatprep.mubr.msk.f32.mxu0 %vm6232_vm1, %v6233_v5  ;;  %5154 = vmatprep.mubr.msk.f32.mxu1 %vm6232_vm1, %v6233_v5 }
  0x94   :  { %5787 = vmatpush3.bf16.msra.mxu0 %v6683_v8  ;;  %5165 = vmatprep.subr.mxu1 %v6233_v5 }
  0x95   :  { %5022 = vmatmul.mubr.msk.f32.gmra.mrb[4].mxu0 %vm35_vm0, %v6392_v25  ;;  %5155 = vmatmul.mubr.msk.f32.gmra.mrb[4].mxu1 %vm35_vm0, %v1112_v9  ;;  %v6891_v9 = vld [vmem:[%s7671_s1 + $0x140] sm:$0xf]  ;;  %v6896_v11 = vpop.permute.xlu0 %846  ;;  %v6911_v12 = vpop.permute.xlu1 %848 }
  0x96   :  { %5166 = vmatpush3.msk.msra.mxu1 %vm45_vm2, %v6593_v57  ;;  %5032 = vmatprep.subr.mxu0 %v6233_v5 }
  0x97   :  { %5167 = vmatprep.mubr.msk.f32.mxu1 %vm6232_vm1, %v6233_v5  ;;  %5830 = vmatprep.subr.bf16.mxu1 %v6231_v4 }
  0x98   :  { %5033 = vmatpush3.msk.msra.mxu0 %vm45_vm2, %v6708_v16  ;;  %5034 = vmatprep.mubr.msk.f32.mxu0 %vm6232_vm1, %v6233_v5 }
  0x99   :  { %5035 = vmatmul.mubr.msk.f32.vlgmr.msra.gmra.mrb[0].mxu0 %vm35_vm0, %v6713_v17  ;;  %5168 = vmatmul.mubr.msk.f32.vlgmr.msra.gmra.mrb[0].mxu1 %vm35_vm0, %v6361_v19  ;;  %v6925_v23 = vpop.permute.xlu0 %850  ;;  %v6978_v30 = vpop.permute.xlu1 %1629 }
  0x9a   :  { %5832 = vmatpush3.bf16.msra.mxu1 %v6602_v58  ;;  %5788 = vmatprep.subr.bf16.mxu0 %v6231_v4 }
  0x9b   :  { %5037 = vmatprep.mubr.msk.f32.mxu0 %vm6232_vm1, %v6233_v5  ;;  %5790 = vmatpush3.bf16.msra.mxu0 %v6718_v22 }
  0x9c   :  { %5170 = vmatprep.mubr.msk.f32.mxu1 %vm6232_vm1, %v6233_v5  ;;  %5833 = vmatprep.subr.bf16.mxu1 %v6231_v4 }
  0x9d   :  { %5038 = vmatmul.mubr.msk.f32.gmra.mrb[2].mxu0 %vm35_vm0, %v6736_v31  ;;  %5171 = vmatmul.mubr.msk.f32.gmra.mrb[2].mxu1 %vm35_vm0, %v6387_v24  ;;  %v6993_v46 = vpop.permute.xlu0 %1631 }
  0x9e   :  { %5835 = vmatpush3.bf16.msra.mxu1 %v6622_v61  ;;  %5791 = vmatprep.subr.bf16.mxu0 %v6231_v4 }
  0x9f   :  { %5173 = vmatprep.mubr.msk.f32.mxu1 %vm6232_vm1, %v6233_v5  ;;  %5184 = vmatprep.subr.mxu1 %v6233_v5 }
  0xa0   :  { %5040 = vmatprep.mubr.msk.f32.mxu0 %vm6232_vm1, %v6233_v5  ;;  %5793 = vmatpush3.bf16.msra.mxu0 %v6744_v35 }
  0xa1   :  { %5041 = vmatmul.mubr.msk.f32.gmra.mrb[4].mxu0 %vm35_vm0, %v6752_v36  ;;  %5174 = vmatmul.mubr.msk.f32.gmra.mrb[4].mxu1 %vm35_vm0, %v6392_v25 }
  0xa2   :  { %5185 = vmatpush3.msk.msra.mxu1 %vm45_vm2, %v6642_v62  ;;  %5051 = vmatprep.subr.mxu0 %v6233_v5 }
  0xa3   :  { %5053 = vmatprep.mubr.msk.f32.mxu0 %vm6232_vm1, %v6233_v5  ;;  %5186 = vmatprep.mubr.msk.f32.mxu1 %vm6232_vm1, %v6233_v5 }
  0xa4   :  { %5052 = vmatpush3.msk.msra.mxu0 %vm45_vm2, %v6773_v48  ;;  %5836 = vmatprep.subr.bf16.mxu1 %v6231_v4 }
  0xa5   :  { %5054 = vmatmul.mubr.msk.f32.vlgmr.msra.gmra.mrb[0].mxu0 %vm35_vm0, %v6413_v27  ;;  %5187 = vmatmul.mubr.msk.f32.vlgmr.msra.gmra.mrb[0].mxu1 %vm35_vm0, %v6713_v17 }
  0xa6   :  { %5838 = vmatpush3.bf16.msra.mxu1 %v6664_v2  ;;  %5794 = vmatprep.subr.bf16.mxu0 %v6231_v4 }
  0xa7   :  { %5056 = vmatprep.mubr.msk.f32.mxu0 %vm6232_vm1, %v6233_v5  ;;  %5796 = vmatpush3.bf16.msra.mxu0 %v6782_v50 }
  0xa8   :  { %5189 = vmatprep.mubr.msk.f32.mxu1 %vm6232_vm1, %v6233_v5  ;;  %5839 = vmatprep.subr.bf16.mxu1 %v6231_v4 }
  0xa9   :  { %5057 = vmatmul.mubr.msk.f32.gmra.mrb[2].mxu0 %vm35_vm0, %v6418_v28  ;;  %5190 = vmatmul.mubr.msk.f32.gmra.mrb[2].mxu1 %vm35_vm0, %v6736_v31 }
  0xaa   :  { %5841 = vmatpush3.bf16.msra.mxu1 %v6683_v8  ;;  %5797 = vmatprep.subr.bf16.mxu0 %v6231_v4 }
  0xab   :  { %5059 = vmatprep.mubr.msk.f32.mxu0 %vm6232_vm1, %v6233_v5  ;;  %5799 = vmatpush3.bf16.msra.mxu0 %v6802_v54 }
  0xac   :  { %5192 = vmatprep.mubr.msk.f32.mxu1 %vm6232_vm1, %v6233_v5  ;;  %5203 = vmatprep.subr.mxu1 %v6233_v5 }
  0xad   :  { %5060 = vmatmul.mubr.msk.f32.gmra.mrb[4].mxu0 %vm35_vm0, %v6445_v32  ;;  %5193 = vmatmul.mubr.msk.f32.gmra.mrb[4].mxu1 %vm35_vm0, %v6752_v36 }
  0xae   :  { %5204 = vmatpush3.msk.msra.mxu1 %vm45_vm2, %v6708_v16  ;;  %5070 = vmatprep.subr.mxu0 %v6233_v5 }
  0xaf   :  { %5071 = vmatpush3.msk.msra.mxu0 %vm45_vm2, %v6822_v55  ;;  %5072 = vmatprep.mubr.msk.f32.mxu0 %vm6232_vm1, %v6233_v5 }
  0xb0   :  { %5205 = vmatprep.mubr.msk.f32.mxu1 %vm6232_vm1, %v6233_v5  ;;  %5842 = vmatprep.subr.bf16.mxu1 %v6231_v4 }
  0xb1   :  { %5073 = vmatmul.mubr.msk.f32.vlgmr.msra.gmra.mrb[0].mxu0 %vm35_vm0, %v6450_v33  ;;  %5206 = vmatmul.mubr.msk.f32.vlgmr.msra.gmra.mrb[0].mxu1 %vm35_vm0, %v6837_v60 }
  0xb2   :  { %5844 = vmatpush3.bf16.msra.mxu1 %v6718_v22  ;;  %5800 = vmatprep.subr.bf16.mxu0 %v6231_v4 }
  0xb3   :  { %5208 = vmatprep.mubr.msk.f32.mxu1 %vm6232_vm1, %v6233_v5  ;;  %5845 = vmatprep.subr.bf16.mxu1 %v6231_v4 }
  0xb4   :  { %5075 = vmatprep.mubr.msk.f32.mxu0 %vm6232_vm1, %v6233_v5  ;;  %5802 = vmatpush3.bf16.msra.mxu0 %v6846_v63 }
  0xb5   :  { %5076 = vmatmul.mubr.msk.f32.gmra.mrb[2].mxu0 %vm35_vm0, %v6474_v37  ;;  %5209 = vmatmul.mubr.msk.f32.gmra.mrb[2].mxu1 %vm35_vm0, %v6860_v3 }
  0xb6   :  { %5847 = vmatpush3.bf16.msra.mxu1 %v6744_v35  ;;  %5803 = vmatprep.subr.bf16.mxu0 %v6231_v4 }
  0xb7   :  { %5078 = vmatprep.mubr.msk.f32.mxu0 %vm6232_vm1, %v6233_v5  ;;  %5211 = vmatprep.mubr.msk.f32.mxu1 %vm6232_vm1, %v6233_v5 }
  0xb8   :  { %5805 = vmatpush3.bf16.msra.mxu0 %v6868_v6  ;;  %5222 = vmatprep.subr.mxu1 %v6233_v5 }
  0xb9   :  { %5079 = vmatmul.mubr.msk.f32.gmra.mrb[4].mxu0 %vm35_vm0, %v6479_v38  ;;  %5212 = vmatmul.mubr.msk.f32.gmra.mrb[4].mxu1 %vm35_vm0, %v6876_v7 }
  0xba   :  { %5223 = vmatpush3.msk.msra.mxu1 %vm45_vm2, %v6773_v48  ;;  %5089 = vmatprep.subr.mxu0 %v6233_v5 }
  0xbb   :  { %5224 = vmatprep.mubr.msk.f32.mxu1 %vm6232_vm1, %v6233_v5  ;;  %5848 = vmatprep.subr.bf16.mxu1 %v6231_v4 }
  0xbc   :  { %5090 = vmatpush3.msk.msra.mxu0 %vm45_vm2, %v6891_v9  ;;  %5091 = vmatprep.mubr.msk.f32.mxu0 %vm6232_vm1, %v6233_v5 }
  0xbd   :  { %5092 = vmatmul.mubr.msk.f32.vlgmr.msra.gmra.mrb[0].mxu0 %vm35_vm0, %v6896_v11  ;;  %5225 = vmatmul.mubr.msk.f32.vlgmr.msra.gmra.mrb[0].mxu1 %vm35_vm0, %v6450_v33 }
  0xbe   :  { %5850 = vmatpush3.bf16.msra.mxu1 %v6782_v50  ;;  %5860 = vmatprep.subr.bf16.mxu0 %v6231_v4 }
  0xbf   :  { %5094 = vmatprep.mubr.msk.f32.mxu0 %vm6232_vm1, %v6233_v5  ;;  %5227 = vmatprep.mubr.msk.f32.mxu1 %vm6232_vm1, %v6233_v5 }
  0xc0   :  { %5851 = vmatprep.subr.bf16.mxu1 %v6231_v4  ;;  %5862 = vmatpush3.bf16.msra.mxu0 %v6315_v10 }
  0xc1   :  { %5095 = vmatmul.mubr.msk.f32.gmra.mrb[2].mxu0 %vm35_vm0, %v6911_v12  ;;  %5228 = vmatmul.mubr.msk.f32.gmra.mrb[2].mxu1 %vm35_vm0, %v6474_v37 }
  0xc2   :  { %5853 = vmatpush3.bf16.msra.mxu1 %v6802_v54  ;;  %5863 = vmatprep.subr.bf16.mxu0 %v6231_v4 }
  0xc3   :  { %5230 = vmatprep.mubr.msk.f32.mxu1 %vm6232_vm1, %v6233_v5  ;;  %5241 = vmatprep.subr.mxu1 %v6233_v5 }
  0xc4   :  { %5097 = vmatprep.mubr.msk.f32.mxu0 %vm6232_vm1, %v6233_v5  ;;  %5865 = vmatpush3.bf16.msra.mxu0 %v6338_v15 }
  0xc5   :  { %5098 = vmatmul.mubr.msk.f32.gmra.mrb[4].mxu0 %vm35_vm0, %v6925_v23  ;;  %5231 = vmatmul.mubr.msk.f32.gmra.mrb[4].mxu1 %vm35_vm0, %v6479_v38 }
  0xc6   :  { %5242 = vmatpush3.msk.msra.mxu1 %vm45_vm2, %v6822_v55  ;;  %5279 = vmatprep.subr.mxu0 %v6233_v5 }
  0xc7   :  { %5243 = vmatprep.mubr.msk.f32.mxu1 %vm6232_vm1, %v6233_v5  ;;  %5854 = vmatprep.subr.bf16.mxu1 %v6231_v4 }
  0xc8   :  { %5280 = vmatpush3.msk.msra.mxu0 %vm45_vm2, %v6369_v20  ;;  %5281 = vmatprep.mubr.msk.f32.mxu0 %vm6232_vm1, %v6233_v5 }
  0xc9   :  { %5244 = vmatmul.mubr.msk.f32.vlgmr.msra.gmra.mrb[0].mxu1 %vm35_vm0, %v6896_v11  ;;  %5282 = vmatmul.mubr.msk.f32.vlgmr.msra.gmra.mrb[6].mxu0 %vm35_vm0, %v6361_v19 }
  0xca   :  { %5856 = vmatpush3.bf16.msra.mxu1 %v6846_v63  ;;  %5866 = vmatprep.subr.bf16.mxu0 %v6231_v4 }
  0xcb   :  { %5246 = vmatprep.mubr.msk.f32.mxu1 %vm6232_vm1, %v6233_v5  ;;  %5857 = vmatprep.subr.bf16.mxu1 %v6231_v4 }
  0xcc   :  { %5284 = vmatprep.mubr.msk.f32.mxu0 %vm6232_vm1, %v6233_v5  ;;  %5868 = vmatpush3.bf16.msra.mxu0 %v6372_v21 }
  0xcd   :  { %5247 = vmatmul.mubr.msk.f32.gmra.mrb[2].mxu1 %vm35_vm0, %v6911_v12  ;;  %5285 = vmatmul.mubr.msk.f32.gmra.mrb[8].mxu0 %vm35_vm0, %v6387_v24 }
  0xce   :  { %5859 = vmatpush3.bf16.msra.mxu1 %v6868_v6  ;;  %5869 = vmatprep.subr.bf16.mxu0 %v6231_v4 }
  0xcf   :  { %5249 = vmatprep.mubr.msk.f32.mxu1 %vm6232_vm1, %v6233_v5  ;;  %5260 = vmatprep.subr.mxu1 %v6233_v5 }
  0xd0   :  { %5287 = vmatprep.mubr.msk.f32.mxu0 %vm6232_vm1, %v6233_v5  ;;  %5871 = vmatpush3.bf16.msra.mxu0 %v6404_v26 }
  0xd1   :  { %5250 = vmatmul.mubr.msk.f32.gmra.mrb[4].mxu1 %vm35_vm0, %v6925_v23  ;;  %5288 = vmatmul.mubr.msk.f32.gmra.mrb[10].mxu0 %vm35_vm0, %v6392_v25 }
  0xd2   :  { %5261 = vmatpush3.msk.msra.mxu1 %vm45_vm2, %v6891_v9  ;;  %5298 = vmatprep.subr.mxu0 %v6233_v5 }
  0xd3   :  { %5262 = vmatprep.mubr.msk.f32.mxu1 %vm6232_vm1, %v6233_v5  ;;  %5300 = vmatprep.mubr.msk.f32.mxu0 %vm6232_vm1, %v6233_v5 }
  0xd4   :  { %5299 = vmatpush3.msk.msra.mxu0 %vm45_vm2, %v6430_v29  ;;  %5914 = vmatprep.subr.bf16.mxu1 %v6231_v4 }
  0xd5   :  { %5263 = vmatmul.mubr.msk.f32.vlgmr.msra.gmra.mrb[0].mxu1 %vm35_vm0, %v6978_v30  ;;  %5301 = vmatmul.mubr.msk.f32.vlgmr.msra.gmra.mrb[6].mxu0 %vm35_vm0, %v6330_v13  ;;  %v7240_v13 = vld [vmem:[%s7670_s0 + $0x5a] sm:$0x3]  ;;  %s6234_s0 = smov 4  }
  0xd6   :  { %5916 = vmatpush3.bf16.msra.mxu1 %v6315_v10  ;;  %5872 = vmatprep.subr.bf16.mxu0 %v6231_v4  ;;  %v7007_v10 = vpop.permute.xlu1 %1633 }
  0xd7   :  { %5265 = vmatprep.mubr.msk.f32.mxu1 %vm6232_vm1, %v6233_v5  ;;  %5917 = vmatprep.subr.bf16.mxu1 %v6231_v4 }
  0xd8   :  { %5303 = vmatprep.mubr.msk.f32.mxu0 %vm6232_vm1, %v6233_v5  ;;  %5874 = vmatpush3.bf16.msra.mxu0 %v6459_v34 }
  0xd9   :  { %5266 = vmatmul.mubr.msk.f32.gmra.mrb[2].mxu1 %vm35_vm0, %v6993_v46  ;;  %5304 = vmatmul.mubr.msk.f32.gmra.mrb[8].mxu0 %vm35_vm0, %v6335_v14  ;;  %v2426_v14 = vpop.permute.xlu0 %2425 }
  0xda   :  { %5919 = vmatpush3.bf16.msra.mxu1 %v6338_v15  ;;  %5875 = vmatprep.subr.bf16.mxu0 %v6231_v4  ;;  %v2428_v15 = vpop.permute.xlu1 %2427 }
  0xdb   :  { %5268 = vmatprep.mubr.msk.f32.mxu1 %vm6232_vm1, %v6233_v5  ;;  %5306 = vmatprep.mubr.msk.f32.mxu0 %vm6232_vm1, %v6233_v5 }
  0xdc   :  { %5877 = vmatpush3.bf16.msra.mxu0 %v6487_v39  ;;  %5450 = vmatprep.subr.mxu1 %v6233_v5 }
  0xdd   :  { %5269 = vmatmul.mubr.msk.f32.gmra.mrb[4].mxu1 %vm35_vm0, %v7007_v10  ;;  %5307 = vmatmul.mubr.msk.f32.gmra.mrb[12].mxu0 %vm35_vm0, %v6356_v18  ;;  %v2430_v18 = vpop.permute.xlu0 %2429 }
  0xde   :  { %5451 = vmatpush3.msk.msra.mxu1 %vm45_vm2, %v6369_v20  ;;  %5317 = vmatprep.subr.mxu0 %v6233_v5 }
  0xdf   :  { %5319 = vmatprep.mubr.msk.f32.mxu0 %vm6232_vm1, %v6233_v5  ;;  %5452 = vmatprep.mubr.msk.f32.mxu1 %vm6232_vm1, %v6233_v5 }
  0xe0   :  { %5318 = vmatpush3.msk.msra.mxu0 %vm45_vm2, %v6503_v40  ;;  %5920 = vmatprep.subr.bf16.mxu1 %v6231_v4 }
  0xe1   :  { %5320 = vmatmul.mubr.msk.f32.vlgmr.msra.gmra.mrb[6].mxu0 %vm35_vm0, %v6713_v17  ;;  %5453 = vmatmul.mubr.msk.f32.vlgmr.msra.gmra.mrb[6].mxu1 %vm35_vm0, %v6713_v17  ;;  %v3190_v20 = vpop.permute.xlu0 %3189 }
  0xe2   :  { %5922 = vmatpush3.bf16.msra.mxu1 %v6372_v21  ;;  %5878 = vmatprep.subr.bf16.mxu0 %v6231_v4 }
  0xe3   :  { %5322 = vmatprep.mubr.msk.f32.mxu0 %vm6232_vm1, %v6233_v5  ;;  %5880 = vmatpush3.bf16.msra.mxu0 %v6553_v49 }
  0xe4   :  { %5455 = vmatprep.mubr.msk.f32.mxu1 %vm6232_vm1, %v6233_v5  ;;  %5923 = vmatprep.subr.bf16.mxu1 %v6231_v4 }
  0xe5   :  { %5323 = vmatmul.mubr.msk.f32.gmra.mrb[8].mxu0 %vm35_vm0, %v6736_v31  ;;  %5456 = vmatmul.mubr.msk.f32.gmra.mrb[8].mxu1 %vm35_vm0, %v6736_v31 }
  0xe6   :  { %5925 = vmatpush3.bf16.msra.mxu1 %v6404_v26  ;;  %5881 = vmatprep.subr.bf16.mxu0 %v6231_v4 }
  0xe7   :  { %5325 = vmatprep.mubr.msk.f32.mxu0 %vm6232_vm1, %v6233_v5  ;;  %5883 = vmatpush3.bf16.msra.mxu0 %v6570_v53 }
  0xe8   :  { %5458 = vmatprep.mubr.msk.f32.mxu1 %vm6232_vm1, %v6233_v5  ;;  %5469 = vmatprep.subr.mxu1 %v6233_v5 }
  0xe9   :  { %5326 = vmatmul.mubr.msk.f32.gmra.mrb[14].mxu0 %vm35_vm0, %v6752_v36  ;;  %5459 = vmatmul.mubr.msk.f32.gmra.mrb[10].mxu1 %vm35_vm0, %v6752_v36 }
  0xea   :  { %5470 = vmatpush3.msk.msra.mxu1 %vm45_vm2, %v6430_v29  ;;  %5336 = vmatprep.subr.mxu0 %v6233_v5 }
  0xeb   :  { %5337 = vmatpush3.msk.msra.mxu0 %vm45_vm2, %v6593_v57  ;;  %5338 = vmatprep.mubr.msk.f32.mxu0 %vm6232_vm1, %v6233_v5 }
  0xec   :  { %5471 = vmatprep.mubr.msk.f32.mxu1 %vm6232_vm1, %v6233_v5  ;;  %5926 = vmatprep.subr.bf16.mxu1 %v6231_v4 }
  0xed   :  { %5339 = vmatmul.mubr.msk.f32.vlgmr.msra.gmra.mrb[6].mxu0 %vm35_vm0, %v6413_v27  ;;  %5472 = vmatmul.mubr.msk.f32.vlgmr.msra.gmra.mrb[6].mxu1 %vm35_vm0, %v6361_v19  ;;  %v3188_v19 = vpop.permute.xlu1 %3187 }
  0xee   :  { %5928 = vmatpush3.bf16.msra.mxu1 %v6459_v34  ;;  %5884 = vmatprep.subr.bf16.mxu0 %v6231_v4 }
  0xef   :  { %5341 = vmatprep.mubr.msk.f32.mxu0 %vm6232_vm1, %v6233_v5  ;;  %5886 = vmatpush3.bf16.msra.mxu0 %v6602_v58 }
  0xf0   :  { %5474 = vmatprep.mubr.msk.f32.mxu1 %vm6232_vm1, %v6233_v5  ;;  %5929 = vmatprep.subr.bf16.mxu1 %v6231_v4 }
  0xf1   :  { %5342 = vmatmul.mubr.msk.f32.gmra.mrb[8].mxu0 %vm35_vm0, %v6418_v28  ;;  %5475 = vmatmul.mubr.msk.f32.gmra.mrb[8].mxu1 %vm35_vm0, %v6387_v24 }
  0xf2   :  { %5931 = vmatpush3.bf16.msra.mxu1 %v6487_v39  ;;  %5887 = vmatprep.subr.bf16.mxu0 %v6231_v4 }
  0xf3   :  { %5344 = vmatprep.mubr.msk.f32.mxu0 %vm6232_vm1, %v6233_v5  ;;  %5889 = vmatpush3.bf16.msra.mxu0 %v6622_v61 }
  0xf4   :  { %5477 = vmatprep.mubr.msk.f32.mxu1 %vm6232_vm1, %v6233_v5  ;;  %5488 = vmatprep.subr.mxu1 %v6233_v5 }
  0xf5   :  { %5345 = vmatmul.mubr.msk.f32.gmra.mrb[16].mxu0 %vm35_vm0, %v6445_v32  ;;  %5478 = vmatmul.mubr.msk.f32.gmra.mrb[12].mxu1 %vm35_vm0, %v6392_v25 }
  0xf6   :  { %5489 = vmatpush3.msk.msra.mxu1 %vm45_vm2, %v6503_v40  ;;  %5355 = vmatprep.subr.mxu0 %v6233_v5 }
  0xf7   :  { %5356 = vmatpush3.msk.msra.mxu0 %vm45_vm2, %v6642_v62  ;;  %5357 = vmatprep.mubr.msk.f32.mxu0 %vm6232_vm1, %v6233_v5 }
  0xf8   :  { %5490 = vmatprep.mubr.msk.f32.mxu1 %vm6232_vm1, %v6233_v5  ;;  %5932 = vmatprep.subr.bf16.mxu1 %v6231_v4 }
  0xf9   :  { %5358 = vmatmul.mubr.msk.f32.vlgmr.msra.gmra.mrb[6].mxu0 %vm35_vm0, %v6450_v33  ;;  %5491 = vmatmul.mubr.msk.f32.vlgmr.msra.gmra.mrb[6].mxu1 %vm35_vm0, %v6837_v60 }
  0xfa   :  { %5934 = vmatpush3.bf16.msra.mxu1 %v6553_v49  ;;  %5890 = vmatprep.subr.bf16.mxu0 %v6231_v4 }
  0xfb   :  { %5360 = vmatprep.mubr.msk.f32.mxu0 %vm6232_vm1, %v6233_v5  ;;  %5892 = vmatpush3.bf16.msra.mxu0 %v6664_v2 }
  0xfc   :  { %5493 = vmatprep.mubr.msk.f32.mxu1 %vm6232_vm1, %v6233_v5  ;;  %5935 = vmatprep.subr.bf16.mxu1 %v6231_v4 }
  0xfd   :  { %5361 = vmatmul.mubr.msk.f32.gmra.mrb[8].mxu0 %vm35_vm0, %v6474_v37  ;;  %5494 = vmatmul.mubr.msk.f32.gmra.mrb[8].mxu1 %vm35_vm0, %v6860_v3 }
  0xfe   :  { %5937 = vmatpush3.bf16.msra.mxu1 %v6570_v53  ;;  %5893 = vmatprep.subr.bf16.mxu0 %v6231_v4 }
  0xff   :  { %5363 = vmatprep.mubr.msk.f32.mxu0 %vm6232_vm1, %v6233_v5  ;;  %5895 = vmatpush3.bf16.msra.mxu0 %v6683_v8 }
 0x100   :  { %5496 = vmatprep.mubr.msk.f32.mxu1 %vm6232_vm1, %v6233_v5  ;;  %5507 = vmatprep.subr.mxu1 %v6233_v5 }
 0x101   :  { %5364 = vmatmul.mubr.msk.f32.gmra.mrb[18].mxu0 %vm35_vm0, %v6479_v38  ;;  %5497 = vmatmul.mubr.msk.f32.gmra.mrb[14].mxu1 %vm35_vm0, %v6876_v7 }
 0x102   :  { %5508 = vmatpush3.msk.msra.mxu1 %vm45_vm2, %v6593_v57  ;;  %5374 = vmatprep.subr.mxu0 %v6233_v5 }
 0x103   :  { %5375 = vmatpush3.msk.msra.mxu0 %vm45_vm2, %v6708_v16  ;;  %5376 = vmatprep.mubr.msk.f32.mxu0 %vm6232_vm1, %v6233_v5 }
 0x104   :  { %5509 = vmatprep.mubr.msk.f32.mxu1 %vm6232_vm1, %v6233_v5  ;;  %5938 = vmatprep.subr.bf16.mxu1 %v6231_v4 }
 0x105   :  { %5377 = vmatmul.mubr.msk.f32.vlgmr.msra.gmra.mrb[6].mxu0 %vm35_vm0, %v6896_v11  ;;  %5510 = vmatmul.mubr.msk.f32.vlgmr.msra.gmra.mrb[6].mxu1 %vm35_vm0, %v6450_v33 }
 0x106   :  { %5940 = vmatpush3.bf16.msra.mxu1 %v6602_v58  ;;  %5896 = vmatprep.subr.bf16.mxu0 %v6231_v4 }
 0x107   :  { %5379 = vmatprep.mubr.msk.f32.mxu0 %vm6232_vm1, %v6233_v5  ;;  %5898 = vmatpush3.bf16.msra.mxu0 %v6718_v22 }
 0x108   :  { %5512 = vmatprep.mubr.msk.f32.mxu1 %vm6232_vm1, %v6233_v5  ;;  %5941 = vmatprep.subr.bf16.mxu1 %v6231_v4 }
 0x109   :  { %5380 = vmatmul.mubr.msk.f32.gmra.mrb[8].mxu0 %vm35_vm0, %v6911_v12  ;;  %5513 = vmatmul.mubr.msk.f32.gmra.mrb[8].mxu1 %vm35_vm0, %v6474_v37 }
 0x10a   :  { %5943 = vmatpush3.bf16.msra.mxu1 %v6622_v61  ;;  %5899 = vmatprep.subr.bf16.mxu0 %v6231_v4 }
 0x10b   :  { %5382 = vmatprep.mubr.msk.f32.mxu0 %vm6232_vm1, %v6233_v5  ;;  %5901 = vmatpush3.bf16.msra.mxu0 %v6744_v35 }
 0x10c   :  { %5515 = vmatprep.mubr.msk.f32.mxu1 %vm6232_vm1, %v6233_v5  ;;  %5526 = vmatprep.subr.mxu1 %v6233_v5 }
 0x10d   :  { %5383 = vmatmul.mubr.msk.f32.gmra.mrb[20].mxu0 %vm35_vm0, %v6925_v23  ;;  %5516 = vmatmul.mubr.msk.f32.gmra.mrb[16].mxu1 %vm35_vm0, %v6479_v38 }
 0x10e   :  { %5527 = vmatpush3.msk.msra.mxu1 %vm45_vm2, %v6642_v62  ;;  %5393 = vmatprep.subr.mxu0 %v6233_v5 }
 0x10f   :  { %5394 = vmatpush3.msk.msra.mxu0 %vm45_vm2, %v6773_v48  ;;  %5395 = vmatprep.mubr.msk.f32.mxu0 %vm6232_vm1, %v6233_v5 }
 0x110   :  { %5528 = vmatprep.mubr.msk.f32.mxu1 %vm6232_vm1, %v6233_v5  ;;  %5944 = vmatprep.subr.bf16.mxu1 %v6231_v4 }
 0x111   :  { %5396 = vmatmul.mubr.msk.f32.vlgmr.msra.gmra.mrb[6].mxu0 %vm35_vm0, %v6515_v41  ;;  %5529 = vmatmul.mubr.msk.f32.vlgmr.msra.gmra.mrb[6].mxu1 %vm35_vm0, %v6896_v11 }
 0x112   :  { %5946 = vmatpush3.bf16.msra.mxu1 %v6664_v2  ;;  %5902 = vmatprep.subr.bf16.mxu0 %v6231_v4 }
 0x113   :  { %5398 = vmatprep.mubr.msk.f32.mxu0 %vm6232_vm1, %v6233_v5  ;;  %5904 = vmatpush3.bf16.msra.mxu0 %v6782_v50 }
 0x114   :  { %5531 = vmatprep.mubr.msk.f32.mxu1 %vm6232_vm1, %v6233_v5  ;;  %5947 = vmatprep.subr.bf16.mxu1 %v6231_v4 }
 0x115   :  { %5399 = vmatmul.mubr.msk.f32.gmra.mrb[8].mxu0 %vm35_vm0, %v6522_v42  ;;  %5532 = vmatmul.mubr.msk.f32.gmra.mrb[8].mxu1 %vm35_vm0, %v6911_v12 }
 0x116   :  { %5949 = vmatpush3.bf16.msra.mxu1 %v6683_v8  ;;  %5905 = vmatprep.subr.bf16.mxu0 %v6231_v4 }
 0x117   :  { %5401 = vmatprep.mubr.msk.f32.mxu0 %vm6232_vm1, %v6233_v5  ;;  %5907 = vmatpush3.bf16.msra.mxu0 %v6802_v54 }
 0x118   :  { %5534 = vmatprep.mubr.msk.f32.mxu1 %vm6232_vm1, %v6233_v5  ;;  %5545 = vmatprep.subr.mxu1 %v6233_v5 }
 0x119   :  { %5402 = vmatmul.mubr.msk.f32.gmra.mrb[22].mxu0 %vm35_vm0, %v6529_v43  ;;  %5535 = vmatmul.mubr.msk.f32.gmra.mrb[18].mxu1 %vm35_vm0, %v6925_v23 }
 0x11a   :  { %5546 = vmatpush3.msk.msra.mxu1 %vm45_vm2, %v6708_v16  ;;  %5412 = vmatprep.subr.mxu0 %v6233_v5 }
 0x11b   :  { %5413 = vmatpush3.msk.msra.mxu0 %vm45_vm2, %v6822_v55  ;;  %5414 = vmatprep.mubr.msk.f32.mxu0 %vm6232_vm1, %v6233_v5 }
 0x11c   :  { %5547 = vmatprep.mubr.msk.f32.mxu1 %vm6232_vm1, %v6233_v5  ;;  %5950 = vmatprep.subr.bf16.mxu1 %v6231_v4 }
 0x11d   :  { %5415 = vmatmul.mubr.msk.f32.vlgmr.msra.gmra.mrb[6].mxu0 %vm35_vm0, %v6536_v44  ;;  %5548 = vmatmul.mubr.msk.f32.vlgmr.msra.gmra.mrb[6].mxu1 %vm35_vm0, %v6978_v30 }
 0x11e   :  { %5952 = vmatpush3.bf16.msra.mxu1 %v6718_v22  ;;  %5908 = vmatprep.subr.bf16.mxu0 %v6231_v4 }
 0x11f   :  { %5417 = vmatprep.mubr.msk.f32.mxu0 %vm6232_vm1, %v6233_v5  ;;  %5910 = vmatpush3.bf16.msra.mxu0 %v6846_v63 }
 0x120   :  { %5550 = vmatprep.mubr.msk.f32.mxu1 %vm6232_vm1, %v6233_v5  ;;  %5953 = vmatprep.subr.bf16.mxu1 %v6231_v4 }
 0x121   :  { %5418 = vmatmul.mubr.msk.f32.gmra.mrb[8].mxu0 %vm35_vm0, %v6543_v45  ;;  %5551 = vmatmul.mubr.msk.f32.gmra.mrb[8].mxu1 %vm35_vm0, %v6993_v46 }
 0x122   :  { %5955 = vmatpush3.bf16.msra.mxu1 %v6744_v35  ;;  %5911 = vmatprep.subr.bf16.mxu0 %v6231_v4 }
 0x123   :  { %5420 = vmatprep.mubr.msk.f32.mxu0 %vm6232_vm1, %v6233_v5  ;;  %5913 = vmatpush3.bf16.msra.mxu0 %v6868_v6 }
 0x124   :  { %5553 = vmatprep.mubr.msk.f32.mxu1 %vm6232_vm1, %v6233_v5  ;;  %5564 = vmatprep.subr.mxu1 %v6233_v5 }
 0x125   :  { %5421 = vmatmul.mubr.msk.f32.gmra.mrb[24].mxu0 %vm35_vm0, %v7240_v13  ;;  %5554 = vmatmul.mubr.msk.f32.gmra.mrb[20].mxu1 %vm35_vm0, %v7007_v10 }
 0x126   :  { %5565 = vmatpush3.msk.msra.mxu1 %vm45_vm2, %v6773_v48  ;;  %5431 = vmatprep.subr.mxu0 %v6233_v5 }
 0x127   :  { %5566 = vmatprep.mubr.msk.f32.mxu1 %vm6232_vm1, %v6233_v5  ;;  %5956 = vmatprep.subr.bf16.mxu1 %v6231_v4 }
 0x128   :  { %5432 = vmatpush3.msk.msra.mxu0 %vm45_vm2, %v6891_v9  ;;  %5433 = vmatprep.mubr.msk.f32.mxu0 %vm6232_vm1, %v6233_v5 }
 0x129   :  { %5434 = vmatmul.mubr.msk.f32.vlgmr.msra.gmra.mrb[6].mxu0 %vm35_vm0, %v2426_v14  ;;  %5567 = vmatmul.mubr.msk.f32.vlgmr.msra.gmra.mrb[6].mxu1 %vm35_vm0, %v6536_v44 }
 0x12a   :  { %5958 = vmatpush3.bf16.msra.mxu1 %v6782_v50  ;;  %5436 = vmatprep.mubr.msk.f32.mxu0 %vm6232_vm1, %v6233_v5 }
 0x12b   :  { %5569 = vmatprep.mubr.msk.f32.mxu1 %vm6232_vm1, %v6233_v5  ;;  %5959 = vmatprep.subr.bf16.mxu1 %v6231_v4 }
 0x12c   :  { %5980 = vmatprep.subr.bf16.mxu0 %v6231_v4 }
 0x12d   :  { %5437 = vmatmul.mubr.msk.f32.gmra.mrb[8].mxu0 %vm35_vm0, %v2428_v15  ;;  %5570 = vmatmul.mubr.msk.f32.gmra.mrb[8].mxu1 %vm35_vm0, %v6543_v45 }
 0x12e   :  { %5961 = vmatpush3.bf16.msra.mxu1 %v6802_v54  ;;  %5572 = vmatprep.mubr.msk.f32.mxu1 %vm6232_vm1, %v6233_v5 }
 0x12f   :  { %5583 = vmatprep.subr.mxu1 %v6233_v5  ;;  %5439 = vmatprep.mubr.msk.f32.mxu0 %vm6232_vm1, %v6233_v5 }
 0x131   :  { %5573 = vmatmul.mubr.msk.f32.gmra.mrb[22].mxu1 %vm35_vm0, %v7240_v13  ;;  %5440 = vmatmul.mubr.msk.f32.gmra.mrb[26].mxu0 %vm35_vm0, %v2430_v18 }
 0x132   :  { %5584 = vmatpush3.msk.msra.mxu1 %vm45_vm2, %v6822_v55  ;;  %5585 = vmatprep.mubr.msk.f32.mxu1 %vm6232_vm1, %v6233_v5 }
 0x133   :  { %5962 = vmatprep.subr.bf16.mxu1 %v6231_v4  ;;  %5645 = vmatprep.mubr.msk.f32.mxu0 %vm6232_vm1, %v6233_v5 }
 0x135   :  { %5586 = vmatmul.mubr.msk.f32.vlgmr.msra.gmra.mrb[6].mxu1 %vm35_vm0, %v2426_v14 }
 0x136   :  { %5964 = vmatpush3.bf16.msra.mxu1 %v6846_v63  ;;  %5588 = vmatprep.mubr.msk.f32.mxu1 %vm6232_vm1, %v6233_v5 }
 0x137   :  { %5965 = vmatprep.subr.bf16.mxu1 %v6231_v4 }
 0x139   :  { %5589 = vmatmul.mubr.msk.f32.gmra.mrb[8].mxu1 %vm35_vm0, %v2428_v15 }
 0x13a   :  { %5967 = vmatpush3.bf16.msra.mxu1 %v6868_v6  ;;  %5591 = vmatprep.mubr.msk.f32.mxu1 %vm6232_vm1, %v6233_v5 }
 0x13b   :  { %5602 = vmatprep.subr.mxu1 %v6233_v5 }
 0x13d   :  { %5592 = vmatmul.mubr.msk.f32.gmra.mrb[24].mxu1 %vm35_vm0, %v2430_v18 }
 0x13e   :  { %5603 = vmatpush3.msk.msra.mxu1 %vm45_vm2, %v6891_v9  ;;  %5604 = vmatprep.mubr.msk.f32.mxu1 %vm6232_vm1, %v6233_v5 }
 0x13f   :  { %5968 = vmatprep.subr.bf16.mxu1 %v6231_v4 }
 0x141   :  { %5605 = vmatmul.mubr.msk.f32.vlgmr.msra.gmra.mrb[6].mxu1 %vm35_vm0, %v3188_v19 }
 0x142   :  { %5607 = vmatprep.mubr.msk.f32.mxu1 %vm6232_vm1, %v6233_v5 }
 0x145   :  { %5608 = vmatmul.mubr.msk.f32.gmra.mrb[8].mxu1 %vm35_vm0, %v3190_v20 }
 0x146   :  { %5610 = vmatprep.mubr.msk.f32.mxu1 %vm6232_vm1, %v6233_v5 }
 0x190   :  { %v7313_v21 = vpop.f32.mrb[0].mxu0 }
 0x191   :  { %v5093_v24 = vpop.f32.mrb[1].mxu0 }
 0x194   :  { %v7315_v25 = vpop.f32.mrb[2].mxu0 }
 0x195   :  { %v5096_v26 = vpop.f32.mrb[3].mxu0 }
 0x198   :  { %v7317_v27 = vpop.f32.mrb[4].mxu0 }
 0x199   :  { %v5099_v28 = vpop.f32.mrb[5].mxu0 }
 0x1a4   :  { %v1833_v29 = vpop.f32.mrb[10].mxu0 }
 0x1a5   :  { %v5289_v32 = vpop.f32.mrb[11].mxu0 }
 0x1a8   :  { %v7319_v33 = vpop.f32.mrb[0].mxu1 }
 0x1a9   :  { %1727 = vrot.lane.b32.xlu1 %v7319_v33, %s6234_s0  ;;  %v5264_v34 = vpop.f32.mrb[1].mxu1  ;;  %v1739_v37 = vmul.f32 %v7319_v33, %v7319_v33 }
 0x1ac   :  { %v7325_v38 = vpop.f32.mrb[2].mxu1 }
 0x1ad   :  { %1745 = vrot.lane.b32.xlu1 %v1739_v37, %s6234_s0  ;;  %1729 = vrot.lane.b32.xlu0 %v7325_v38, %s6234_s0  ;;  %v5267_v39 = vpop.f32.mrb[3].mxu1  ;;  %v1740_v40 = vmul.f32 %v7325_v38, %v7325_v38 }
 0x1b0   :  { %v7332_v41 = vpop.f32.mrb[4].mxu1  ;;  %v1912_v42 = vpop.f32.mrb[12].mxu0 }
 0x1b1   :  { %1747 = vrot.lane.b32.xlu0 %v1740_v40, %s6234_s0  ;;  %1731 = vrot.lane.b32.xlu1 %v7332_v41, %s6234_s0  ;;  %v5270_v43 = vpop.f32.mrb[5].mxu1  ;;  %v5308_v44 = vpop.f32.mrb[13].mxu0 }
 0x1bc   :  { %v1991_v45 = vpop.f32.mrb[14].mxu0  ;;  %v2619_v49 = vpop.f32.mrb[10].mxu1 }
 0x1bd   :  { %v5327_v53 = vpop.f32.mrb[15].mxu0  ;;  %v5460_v57 = vpop.f32.mrb[11].mxu1  ;;  %v1741_v49 = vmul.f32 %v7332_v41, %v7332_v41 }
 0x1be   :  { %v944_v53 = vmul.f32 %v7313_v21, %v7313_v21 }
 0x1c8   :  { %v2698_v58 = vpop.f32.mrb[12].mxu1  ;;  %v2072_v61 = vpop.f32.mrb[16].mxu0 }
 0x1c9   :  { %v5479_v62 = vpop.f32.mrb[13].mxu1  ;;  %v5346_v2 = vpop.f32.mrb[17].mxu0 }
 0x1d4   :  { %v2777_v8 = vpop.f32.mrb[14].mxu1  ;;  %v2153_v16 = vpop.f32.mrb[18].mxu0 }
 0x1d5   :  { %v5498_v17 = vpop.f32.mrb[15].mxu1  ;;  %v5365_v22 = vpop.f32.mrb[19].mxu0  ;;  %v945_v8 = vmul.f32 %v7315_v25, %v7315_v25 }
 0x1e0   :  { %v2234_v31 = vpop.f32.mrb[20].mxu0  ;;  %v2858_v35 = vpop.f32.mrb[16].mxu1 }
 0x1e1   :  { %v5384_v36 = vpop.f32.mrb[21].mxu0  ;;  %v5517_v47 = vpop.f32.mrb[17].mxu1 }
 0x1ec   :  { %v2939_v48 = vpop.f32.mrb[18].mxu1  ;;  %v2327_v50 = vpop.f32.mrb[22].mxu0 }
 0x1ed   :  { %v5536_v51 = vpop.f32.mrb[19].mxu1  ;;  %v5403_v52 = vpop.f32.mrb[23].mxu0  ;;  %v3316_v50 = vld [vmem:[%s7673_s3] sm:$0xff] }
 0x1ee   :  { %v3317_v51 = vld [vmem:[%s7673_s3 + $0x8] sm:$0xff]  ;;  %v3318_v52 = vld [vmem:[%s7673_s3 + $0x10] sm:$0xff] }
 0x1f8   :  { %v3020_v54 = vpop.f32.mrb[20].mxu1  ;;  %v2420_v55 = vpop.f32.mrb[24].mxu0 }
 0x1f9   :  { %v5555_v56 = vpop.f32.mrb[21].mxu1  ;;  %v5422_v59 = vpop.f32.mrb[25].mxu0  ;;  %v5969_v54 = vpack.c.bf16 %v3317_v51, %v3316_v50  ;;  %v3319_v55 = vld [vmem:[%s7673_s3 + $0x18] sm:$0xff] }
 0x1fa   :  { %v5972_v56 = vpack.c.bf16 %v3319_v55, %v3318_v52 }
 0x1fb   :  { %5970 = vmatpush3.bf16.msra.mxu1 %v5969_v54 }
 0x1fc   :  { %v7337_v60 = vpop.f32.mrb[6].mxu0  ;;  %5971 = vmatprep.subr.bf16.mxu1 %v6231_v4 }
 0x1fd   :  { %v5435_v63 = vpop.f32.mrb[7].mxu0  ;;  %v2530_v0 = vmul.f32 %v7337_v60, %v7337_v60  ;;  %v2521_v3 = vrot.slane %v7337_v60, 6 }
 0x1ff   :  { %v2534_v11 = vrot.slane %v2530_v0, 6  ;;  %5973 = vmatpush3.bf16.msra.mxu1 %v5972_v56 }
 0x200   :  { %v7341_v1 = vpop.f32.mrb[8].mxu0  ;;  %5974 = vmatprep.subr.bf16.mxu1 %v6231_v4 }
 0x201   :  { %v2522_v6 = vrot.slane %v7341_v1, 6  ;;  %v7347_v7 = vmul.f32 %v7341_v1, %v7341_v1  ;;  %v5438_v9 = vpop.f32.mrb[9].mxu0 }
 0x203   :  { %v2535_v12 = vrot.slane %v7347_v7, 6  ;;  %v2523_v23 = vsel %vm2520_vm3, %v2521_v3, %v2522_v6 }
 0x204   :  { %v3101_v30 = vpop.f32.mrb[22].mxu1  ;;  %v2513_v46 = vpop.f32.mrb[26].mxu0 }
 0x205   :  { %v5574_v10 = vpop.f32.mrb[23].mxu1  ;;  %v5441_v14 = vpop.f32.mrb[27].mxu0  ;;  %v2536_v15 = vsel %vm2520_vm3, %v2534_v11, %v2535_v12  ;;  %v946_v46 = vmul.f32 %v7317_v27, %v7317_v27 }
 0x210   :  { %v3182_v18 = vpop.f32.mrb[24].mxu1 }
 0x211   :  { %v5593_v19 = vpop.f32.mrb[25].mxu1 }
 0x214   :  { %v7354_v20 = vpop.f32.mrb[6].mxu1 }
 0x215   :  { %v3282_v24 = vrot.slane %v7354_v20, 6  ;;  %v5606_v26 = vpop.f32.mrb[7].mxu1  ;;  %v3297_v28 = vmul.f32 %v7354_v20, %v7354_v20 }
 0x217   :  { %3285 = vrot.lane.b32.xlu0 %v3282_v24, %s6234_s0  ;;  %v3301_v42 = vrot.slane %v3297_v28, 6 }
 0x218   :  { %v7360_v29 = vpop.f32.mrb[8].mxu1 }
 0x219   :  { %v3283_v32 = vrot.slane %v7360_v29, 6  ;;  %v3298_v34 = vmul.f32 %v7360_v29, %v7360_v29  ;;  %v5609_v37 = vpop.f32.mrb[9].mxu1 }
 0x21b   :  { %v1728_v39 = vpop.permute.xlu1 %1727  ;;  %3289 = vrot.lane.b32.xlu0 %v3283_v32, %s6234_s0  ;;  %v3284_v40 = vsel %vm2520_vm3, %v3282_v24, %v3283_v32  ;;  %v3302_v43 = vrot.slane %v3298_v34, 6 }
 0x21c   :  { %v1736_v44 = vadd.f32 %v1728_v39, %v7313_v21  ;;  %3287 = vrot.lane.b32.xlu1 %v3284_v40, %s6234_s0 }
 0x21d   :  { %v3303_v45 = vsel %vm2520_vm3, %v3301_v42, %v3302_v43 }
 0x21e   :  { %v2527_v57 = vadd.f32 %v2521_v3, %v1736_v44 }
 0x21f   :  { %v1746_v58 = vpop.permute.xlu1 %1745  ;;  %3304 = vrot.lane.b32.xlu0 %v3301_v42, %s6234_s0  ;;  %v1730_v61 = vpop.permute.xlu0 %1729 }
 0x220   :  { %v1754_v62 = vadd.f32 %v1746_v58, %v944_v53  ;;  %v1737_v2 = vadd.f32 %v1730_v61, %v7315_v25  ;;  %1749 = vrot.lane.b32.xlu1 %v1741_v49, %s6234_s0 }
 0x222   :  { %v2528_v16 = vadd.f32 %v2523_v23, %v1737_v2  ;;  %v2540_v17 = vadd.f32 %v2534_v11, %v1754_v62 }
 0x223   :  { %v1732_v22 = vpop.permute.xlu1 %1731  ;;  %3308 = vrot.lane.b32.xlu0 %v3302_v43, %s6234_s0  ;;  %v1748_v31 = vpop.permute.xlu0 %1747 }
 0x224   :  { %v1738_v35 = vadd.f32 %v1732_v22, %v7317_v27  ;;  %v1755_v36 = vadd.f32 %v1748_v31, %v945_v8  ;;  %3306 = vrot.lane.b32.xlu1 %v3303_v45, %s6234_s0 }
 0x226   :  { %v2529_v47 = vadd.f32 %v2522_v6, %v1738_v35  ;;  %v2541_v48 = vadd.f32 %v2536_v15, %v1755_v36 }
 0x228   :  { %3191 = vrot.lane.b32.xlu1 %v7240_v13, %s6230_s19 }
 0x289   :  { %v3286_v13 = vpop.permute.xlu0 %3285 }
 0x28a   :  { %v3294_v59 = vadd.f32 %v3286_v13, %v2527_v57 }
 0x28c   :  { %v3327_v11 = vrot.slane %v3294_v59, 2 }
 0x28d   :  { %v3290_v63 = vpop.permute.xlu0 %3289 }
 0x28e   :  { %v3296_v0 = vadd.f32 %v3290_v63, %v2529_v47  ;;  %v3288_v3 = vpop.permute.xlu1 %3287 }
 0x28f   :  { %v3295_v6 = vadd.f32 %v3288_v3, %v2528_v16 }
 0x290   :  { %v3330_v9 = vrot.slane %v3296_v0, 2 }
 0x291   :  { %v3328_v23 = vrot.slane %v3295_v6, 2  ;;  %v3305_v30 = vpop.permute.xlu0 %3304 }
 0x292   :  { %v1750_v10 = vpop.permute.xlu1 %1749  ;;  %v3313_v28 = vadd.f32 %v3305_v30, %v2540_v17 }
 0x293   :  { %v3329_v14 = vsel %vm3326_vm4, %v3327_v11, %v3328_v23  ;;  %v3331_v15 = vsel %vm3326_vm4, %v3328_v23, %v3330_v9  ;;  %v1756_v18 = vadd.f32 %v1750_v10, %v946_v46  ;;  %v3320_v23 = vld [vmem:[%s7673_s3 + $0x20] sm:$0x1] }
 0x294   :  { %v3335_v19 = vsel %vm3334_vm5, %v3329_v14, 0.0  ;;  %v3336_v24 = vsel %vm3334_vm5, %v3331_v15, 0.0  ;;  %v3347_v43 = vrot.slane %v3313_v28, 2  ;;  %v3321_v14 = vld [vmem:[%s7673_s3 + $0x21] sm:$0x1] }
 0x295   :  { %v3337_v26 = vadd.f32 %v3336_v24, %v3335_v19  ;;  %v3309_v32 = vpop.permute.xlu0 %3308  ;;  %v2542_v34 = vadd.f32 %v2535_v12, %v1756_v18 }
 0x296   :  { %v3307_v37 = vpop.permute.xlu1 %3306 }
 0x297   :  { %v3338_v39 = vrot.slane %v3337_v26, 4  ;;  %v3315_v40 = vadd.f32 %v3309_v32, %v2542_v34  ;;  %v3314_v42 = vadd.f32 %v3307_v37, %v2541_v48 }
 0x299   :  { %v3350_v44 = vrot.slane %v3315_v40, 2  ;;  %v3348_v45 = vrot.slane %v3314_v42, 2  ;;  %v3339_v49 = vadd.f32 %v3338_v39, %v3337_v26 }
 0x29a   :  { %v3192_v53 = vpop.permute.xlu1 %3191 }
 0x29b   :  { %v3349_v57 = vsel %vm3326_vm4, %v3347_v43, %v3348_v45  ;;  %v3351_v58 = vsel %vm3326_vm4, %v3348_v45, %v3350_v44  ;;  %v3340_v61 = vrot.slane %v3339_v49, 2  ;;  %5611 = vmatmul.mubr.msk.f32.gmra.mrb[26].mxu1 %vm35_vm0, %v3192_v53 }
 0x29c   :  { %v3354_v62 = vsel %vm3334_vm5, %v3349_v57, 0.0  ;;  %v3355_v7 = vsel %vm3334_vm5, %v3351_v58, 0.0  ;;  %5621 = vmatprep.mubr.msk.f32.mxu1 %vm6232_vm1, %v6233_v5  ;;  %v3624_v57 = vld [vmem:[%s7672_s2 + $0x24] sm:$0xff]  ;;  %v3625_v58 = vld [vmem:[%s7672_s2 + $0x2c] sm:$0xff] }
 0x29d   :  { %v3356_v12 = vadd.f32 %v3355_v7, %v3354_v62  ;;  %v3341_v2 = vadd.f32 %v3340_v61, %v3339_v49  ;;  %v3618_v61 = vld [vmem:[%s7672_s2] sm:$0xff]  ;;  %v5981_v62 = vpack.c.bf16 %v3625_v58, %v3624_v57  ;;  %v3619_v7 = vld [vmem:[%s7672_s2 + $0x8] sm:$0xff] }
 0x29e   :  { %v3867_v57 = vld [vmem:[%s7672_s2 + $0x7c] sm:$0xff]  ;;  %v3868_v58 = vld [vmem:[%s7672_s2 + $0x84] sm:$0xff] }
 0x29f   :  { %v3357_v8 = vrot.slane %v3356_v12, 4  ;;  %v3342_v16 = vrot.slane %v3341_v2, 1  ;;  %5982 = vmatpush3.bf16.msra.mxu0 %v5981_v62 }
 0x2a0   :  { %5983 = vmatprep.subr.bf16.mxu0 %v6231_v4 }
 0x2a1   :  { %v3343_v17 = vadd.f32 %v3342_v16, %v3341_v2  ;;  %v3358_v22 = vadd.f32 %v3357_v8, %v3356_v12  ;;  %v5987_v12 = vpack.c.bf16 %v3619_v7, %v3618_v61  ;;  %v3626_v2 = vld [vmem:[%s7672_s2 + $0x34] sm:$0xff]  ;;  %v3627_v8 = vld [vmem:[%s7672_s2 + $0x3c] sm:$0xff] }
 0x2a2   :  { %v3620_v16 = vld [vmem:[%s7672_s2 + $0x10] sm:$0xff] }
 0x2a3   :  { %3364 = vrot.lane.b32.xlu0 %v3343_v17, %s6230_s19  ;;  %v3359_v31 = vrot.slane %v3358_v22, 2  ;;  %v5984_v17 = vpack.c.bf16 %v3627_v8, %v3626_v2  ;;  %v3948_v2 = vld [vmem:[%s7672_s2 + $0x90] sm:$0xff]  ;;  %v3949_v8 = vld [vmem:[%s7672_s2 + $0x98] sm:$0xff] }
 0x2a5   :  { %v3360_v35 = vadd.f32 %v3359_v31, %v3358_v22  ;;  %v3621_v22 = vld [vmem:[%s7672_s2 + $0x18] sm:$0xff]  ;;  %5985 = vmatpush3.bf16.msra.mxu0 %v5984_v17 }
 0x2a6   :  { %v5990_v31 = vpack.c.bf16 %v3621_v22, %v3620_v16  ;;  %5643 = vmatprep.subr.mxu0 %v6233_v5  ;;  %v4031_v16 = vld [vmem:[%s7672_s2 + $0xb4] sm:$0xff]  ;;  %v4032_v17 = vld [vmem:[%s7672_s2 + $0xbc] sm:$0xff]  ;;  %v3786_v22 = vld [vmem:[%s7672_s2 + $0x68] sm:$0xf] }
 0x2a7   :  { %v3361_v36 = vrot.slane %v3360_v35, 1 }
 0x2a9   :  { %v3362_v47 = vadd.f32 %v3361_v36, %v3360_v35  ;;  %v3628_v35 = vld [vmem:[%s7672_s2 + $0x44] sm:$0xf]  ;;  %v3622_v36 = vld [vmem:[%s7672_s2 + $0x20] sm:$0xf] }
 0x2aa   :  { %5644 = vmatpush3.msk.msra.mxu0 %vm45_vm2, %v3628_v35  ;;  %v6005_v35 = vpack.c.bf16 %v3949_v8, %v3948_v2 }
 0x2ab   :  { %3441 = vrot.lane.b32.xlu1 %v3362_v47, %s6230_s19  ;;  %5992 = vmatprep.subr.bf16.mxu0 %v6231_v4 }
 0x315   :  { %v3365_v48 = vpop.permute.xlu0 %3364 }
 0x316   :  { %5622 = vmatmul.mubr.msk.f32.vlgmr.msra.gmra.mrb[28].mxu1 %vm3366_vm6, %v3365_v48 }
 0x317   :  { %5976 = vmatpush3.bf16.msra.mxu1 %v5969_v54  ;;  %5632 = vmatprep.mubr.msk.f32.mxu1 %vm6232_vm1, %v6233_v5 }
 0x318   :  { %5977 = vmatprep.subr.bf16.mxu1 %v6231_v4 }
 0x31b   :  { %5979 = vmatpush3.bf16.msra.mxu1 %v5972_v56  ;;  %v3527_v56 = vlaneseq }
 0x31c   :  { %5986 = vmatprep.subr.bf16.mxu1 %v6231_v4 }
 0x31d   :  { %v3442_v50 = vpop.permute.xlu1 %3441  ;;  %v3528_v11 = vshrl.u32 %v3527_v56, 7 }
 0x31e   :  { %5633 = vmatmul.mubr.msk.f32.vlgmr.msra.gmra.mrb[30].mxu1 %vm3366_vm6, %v3442_v50 }
 0x31f   :  { %5658 = vmatprep.mubr.msk.f32.mxu1 %vm6232_vm1, %v6233_v5  ;;  %v3529_v30 = vsub.s32 0, %v3528_v11  ;;  %5988 = vmatpush3.bf16.msra.mxu1 %v5987_v12  ;;  %v6002_v12 = vpack.c.bf16 %v3868_v58, %v3867_v57 }
 0x320   :  { %5989 = vmatprep.subr.bf16.mxu1 %v6231_v4 }
 0x323   :  { %5991 = vmatpush3.bf16.msra.mxu1 %v5990_v31  ;;  %v3869_v31 = vld [vmem:[%s7672_s2 + $0x8c] sm:$0xf] }
 0x324   :  { %5656 = vmatprep.subr.mxu1 %v6233_v5 }
 0x327   :  { %5657 = vmatpush3.msk.msra.mxu1 %vm45_vm2, %v3622_v36  ;;  %v6011_v36 = vpack.c.bf16 %v4032_v17, %v4031_v16 }
 0x328   :  { %5998 = vmatprep.subr.bf16.mxu1 %v6231_v4 }
 0x36e   :  { %v3275_v51 = vpop.f32.mrb[26].mxu1 }
 0x36f   :  { %v5612_v52 = vpop.f32.mrb[27].mxu1 }
 0x3e9   :  { %v3435_v55 = vpop.f32.mrb[28].mxu1 }
 0x3ea   :  { %v5623_v13 = vpop.f32.mrb[29].mxu1  ;;  %v3439_v59 = vmul.f32 0.001953125, %v3435_v55 }
 0x3ec   :  { %v3516_v63 = vmul.f32 %v3439_v59, %v3439_v59 }
 0x3f1   :  { %v3511_v54 = vpop.f32.mrb[30].mxu1 }
 0x3f2   :  { %v3515_v0 = vmul.f32 0.001953125, %v3511_v54  ;;  %v5634_v3 = vpop.f32.mrb[31].mxu1 }
 0x3f3   :  { %v3552_v3 = vld [vmem:[#allocation2 + $0x2] sm:$0xff] }
 0x3f4   :  { %v3517_v6 = vsub.f32 %v3515_v0, %v3516_v63 }
 0x3f6   :  { %v3518_v9 = vadd.f32 1e-05, %v3517_v6  ;;  %v3553_v6 = vld [vmem:[#allocation2 + $0xa] sm:$0xff] }
 0x3f8   :  { %6200 = vrsqrt.f32 %v3518_v9 }
 0x402   :  { %v6201_v46 = vpop.eup %6200 }
 0x403   :  { %v3520_v10 = vmul.f32 %v6201_v46, %v3320_v23 }
 0x405   :  { %v3521_v15 = vmul.f32 %v3520_v10, %v3439_v59  ;;  %v3530_v18 = vrot.slane %v3520_v10, %v3529_v30 }
 0x407   :  { %v3522_v19 = vsub.f32 %v3321_v14, %v3521_v15  ;;  %v3568_v24 = vmul.f32 %v3530_v18, %v7319_v33  ;;  %v3569_v26 = vmul.f32 %v3530_v18, %v7325_v38  ;;  %v3570_v28 = vmul.f32 %v3530_v18, %v7332_v41  ;;  %3532 = vrot.lane.b32.xlu0 %v3530_v18, %s6234_s0 }
 0x408   :  { %v3605_v32 = vmul.f32 %v3530_v18, %v7354_v20  ;;  %v3606_v34 = vmul.f32 %v3530_v18, %v7360_v29 }
 0x409   :  { %v3541_v37 = vrot.slane %v3522_v19, %v3529_v30 }
 0x40b   :  { %3543 = vrot.lane.b32.xlu1 %v3541_v37, %s6234_s0  ;;  %v3571_v39 = vadd.f32 %v3568_v24, %v3541_v37  ;;  %v3572_v40 = vadd.f32 %v3569_v26, %v3541_v37  ;;  %v3573_v42 = vadd.f32 %v3570_v28, %v3541_v37  ;;  %v7437_v43 = vadd.f32 %v3605_v32, %v3541_v37 }
 0x40c   :  { %v7439_v44 = vadd.f32 %v3606_v34, %v3541_v37 }
 0x40d   :  { %v3574_v33 = vmax.f32 %v3571_v39, 0.0  ;;  %v3575_v38 = vmax.f32 %v3572_v40, 0.0  ;;  %v3576_v45 = vmax.f32 %v3573_v42, 0.0 }
 0x40f   :  { %v3582_v41 = vrot.slane %v3574_v33, 2  ;;  %v3583_v49 = vrot.slane %v3575_v38, 2  ;;  %v3585_v53 = vrot.slane %v3576_v45, 2  ;;  %v3782_v45 = vld [vmem:[%s7672_s2 + $0x48] sm:$0xff] }
 0x411   :  { %v3584_v20 = vsel %vm3326_vm4, %v3582_v41, %v3583_v49  ;;  %v3586_v29 = vsel %vm3326_vm4, %v3583_v49, %v3585_v53  ;;  %v3783_v41 = vld [vmem:[%s7672_s2 + $0x50] sm:$0xff] }
 0x412   :  { %v5993_v49 = vpack.c.bf16 %v3783_v41, %v3782_v45 }
 0x479   :  { %v3533_v47 = vpop.permute.xlu0 %3532 }
 0x47a   :  { %v3535_v48 = vmul.f32 %v3533_v47, %v7313_v21  ;;  %v3536_v50 = vmul.f32 %v3533_v47, %v7315_v25  ;;  %v3537_v51 = vmul.f32 %v3533_v47, %v7317_v27  ;;  %v3593_v15 = vmul.f32 %v3533_v47, %v7337_v60 }
 0x47b   :  { %v3594_v18 = vmul.f32 %v3533_v47, %v7341_v1  ;;  %v3609_v60 = vmax.f32 %v7437_v43, 0.0  ;;  %v3610_v1 = vmax.f32 %v7439_v44, 0.0  ;;  %v3865_v43 = vld [vmem:[%s7672_s2 + $0x6c] sm:$0xff]  ;;  %v3866_v44 = vld [vmem:[%s7672_s2 + $0x74] sm:$0xff]  ;;  %v3950_v47 = vld [vmem:[%s7672_s2 + $0xa0] sm:$0xff] }
 0x47c   :  { %v5999_v53 = vpack.c.bf16 %v3866_v44, %v3865_v43 }
 0x47d   :  { %v3544_v52 = vpop.permute.xlu1 %3543 }
 0x47e   :  { %v3546_v55 = vadd.f32 %v3544_v52, %v3535_v48  ;;  %v3547_v13 = vadd.f32 %v3544_v52, %v3536_v50  ;;  %v3548_v59 = vadd.f32 %v3544_v52, %v3537_v51  ;;  %v3595_v19 = vadd.f32 %v3593_v15, %v3544_v52  ;;  %v3951_v48 = vld [vmem:[%s7672_s2 + $0xa8] sm:$0xff]  ;;  %v4280_v15 = vld [vmem:[%s7672_s2 + $0x120] sm:$0xff] }
 0x47f   :  { %v3596_v24 = vadd.f32 %v3594_v18, %v3544_v52  ;;  %v4033_v50 = vld [vmem:[%s7672_s2 + $0xc4] sm:$0xff] }
 0x480   :  { %v3549_v54 = vmax.f32 %v3546_v55, 0.0  ;;  %v3550_v63 = vmax.f32 %v3547_v13, 0.0  ;;  %v3551_v0 = vmax.f32 %v3548_v59, 0.0  ;;  %v3597_v26 = vmax.f32 %v3595_v19, 0.0  ;;  %v4034_v55 = vld [vmem:[%s7672_s2 + $0xcc] sm:$0xff] }
 0x481   :  { %v3598_v28 = vmax.f32 %v3596_v24, 0.0  ;;  %v6008_v13 = vpack.c.bf16 %v3951_v48, %v3950_v47  ;;  %v6014_v59 = vpack.c.bf16 %v4034_v55, %v4033_v50  ;;  %v4281_v18 = vld [vmem:[%s7672_s2 + $0x128] sm:$0xff]  ;;  %v4118_v19 = vld [vmem:[%s7672_s2 + $0xf8] sm:$0xf]  ;;  %v4201_v24 = vld [vmem:[%s7672_s2 + $0x11c] sm:$0xf] }
 0x482   :  { %v3557_v9 = vrot.slane %v3549_v54, 2  ;;  %v3558_v56 = vrot.slane %v3550_v63, 2  ;;  %v3560_v11 = vrot.slane %v3551_v0, 2  ;;  %v4114_v54 = vld [vmem:[%s7672_s2 + $0xd8] sm:$0xff]  ;;  %v4115_v63 = vld [vmem:[%s7672_s2 + $0xe0] sm:$0xff] }
 0x483   :  { %v4197_v0 = vld [vmem:[%s7672_s2 + $0xfc] sm:$0xff] }
 0x484   :  { %v3559_v23 = vsel %vm3326_vm4, %v3557_v9, %v3558_v56  ;;  %v3561_v21 = vsel %vm3326_vm4, %v3558_v56, %v3560_v11  ;;  %v4035_v9 = vld [vmem:[%s7672_s2 + $0xd4] sm:$0xf]  ;;  %v6017_v56 = vpack.c.bf16 %v4115_v63, %v4114_v54 }
 0x485   :  { %v3564_v30 = vmax.f32 %v3552_v3, %v3559_v23  ;;  %v3565_v25 = vmax.f32 %v3553_v6, %v3561_v21  ;;  %v4198_v3 = vld [vmem:[%s7672_s2 + $0x104] sm:$0xff]  ;;  %v3952_v6 = vld [vmem:[%s7672_s2 + $0xb0] sm:$0xf] }
 0x486   :  { %v6023_v11 = vpack.c.bf16 %v4198_v3, %v4197_v0  ;;  %v4116_v23 = vld [vmem:[%s7672_s2 + $0xe8] sm:$0xff]  ;;  %v4117_v21 = vld [vmem:[%s7672_s2 + $0xf0] sm:$0xff] }
 0x487   :  { %3566 = vst.msk [vmem:[#allocation2 + $0x2] sm:$0xff] %vm3334_vm5, %v3564_v30  ;;  %3567 = vst.msk [vmem:[#allocation2 + $0xa] sm:$0xff] %vm3334_vm5, %v3565_v25  ;;  %v4199_v30 = vld [vmem:[%s7672_s2 + $0x10c] sm:$0xff] }
 0x48e   :  { %v3577_v27 = vld [vmem:[#allocation2 + $0x2] sm:$0xff]  ;;  %v3578_v46 = vld [vmem:[#allocation2 + $0xa] sm:$0xff] }
 0x48f   :  { %v3589_v10 = vmax.f32 %v3577_v27, %v3584_v20  ;;  %v3590_v14 = vmax.f32 %v3578_v46, %v3586_v29  ;;  %v3784_v20 = vld [vmem:[%s7672_s2 + $0x58] sm:$0xff]  ;;  %v3785_v29 = vld [vmem:[%s7672_s2 + $0x60] sm:$0xff] }
 0x490   :  { %v5996_v7 = vpack.c.bf16 %v3785_v29, %v3784_v20  ;;  %v4200_v46 = vld [vmem:[%s7672_s2 + $0x114] sm:$0xff] }
 0x491   :  { %3591 = vst.msk [vmem:[#allocation2 + $0x2] sm:$0xff] %vm3366_vm6, %v3589_v10  ;;  %3592 = vst.msk [vmem:[#allocation2 + $0xa] sm:$0xff] %vm3366_vm6, %v3590_v14  ;;  %v6020_v10 = vpack.c.bf16 %v4117_v21, %v4116_v23  ;;  %v6026_v14 = vpack.c.bf16 %v4200_v46, %v4199_v30 }
 0x498   :  { %v3599_v32 = vld [vmem:[#allocation2] sm:$0xff]  ;;  %v3600_v34 = vld [vmem:[#allocation2 + $0x8] sm:$0xff] }
 0x499   :  { %v3601_v37 = vmax.f32 %v3599_v32, %v3597_v26  ;;  %v3602_v39 = vmax.f32 %v3600_v34, %v3598_v28  ;;  %v6029_v26 = vpack.c.bf16 %v4281_v18, %v4280_v15  ;;  %v4282_v28 = vld [vmem:[%s7672_s2 + $0x130] sm:$0xff] }
 0x49b   :  { %3603 = vst.msk [vmem:[#allocation2] sm:$0xff] %vm3334_vm5, %v3601_v37  ;;  %3604 = vst.msk [vmem:[#allocation2 + $0x8] sm:$0xff] %vm3334_vm5, %v3602_v39  ;;  %v4283_v37 = vld [vmem:[%s7672_s2 + $0x138] sm:$0xff] }
 0x49c   :  { %v6032_v39 = vpack.c.bf16 %v4283_v37, %v4282_v28 }
 0x4a2   :  { %v3611_v40 = vld [vmem:[#allocation2] sm:$0xff]  ;;  %v3612_v42 = vld [vmem:[#allocation2 + $0x8] sm:$0xff] }
 0x4a3   :  { %v3613_v33 = vmax.f32 %v3611_v40, %v3609_v60  ;;  %v3614_v38 = vmax.f32 %v3612_v42, %v3610_v1  ;;  %v4284_v60 = vld [vmem:[%s7672_s2 + $0x140] sm:$0xf]  ;;  %v4279_v1 = vld [vmem:[#allocation2 + $0x10] sm:$0x3] }
 0x4a5   :  { %3615 = vst.msk [vmem:[#allocation2] sm:$0xff] %vm3366_vm6, %v3613_v33  ;;  %3616 = vst.msk [vmem:[#allocation2 + $0x8] sm:$0xff] %vm3366_vm6, %v3614_v38 }
 0x4ac   :  { %v3623_v61 = vld [vmem:[#allocation2 + $0x2] sm:$0x3]  ;;  %v3617_v62 = vld [vmem:[#allocation2] sm:$0x3]  ;;  %v3781_v51 = vld [vmem:[#allocation2 + $0x4] sm:$0x3] }
 0x4ad   :  { %5646 = vmatmul.mubr.msk.f32.vlgmr.msra.gmra.mrb[28].mxu0 %vm35_vm0, %v3623_v61  ;;  %5659 = vmatmul.mubr.msk.f32.vlgmr.msra.gmra.mrb[32].mxu1 %vm35_vm0, %v3617_v62  ;;  %v3864_v52 = vld [vmem:[#allocation2 + $0x6] sm:$0x3]  ;;  %v3947_v25 = vld [vmem:[#allocation2 + $0x8] sm:$0x3]  ;;  %v4030_v27 = vld [vmem:[#allocation2 + $0xa] sm:$0x3] }
 0x4ae   :  { %5994 = vmatpush3.bf16.msra.mxu0 %v5993_v49  ;;  %6000 = vmatpush3.bf16.msra.mxu1 %v5999_v53  ;;  %v4113_v32 = vld [vmem:[#allocation2 + $0xc] sm:$0x3]  ;;  %v4196_v34 = vld [vmem:[#allocation2 + $0xe] sm:$0x3] }
 0x4af   :  { %5995 = vmatprep.subr.bf16.mxu0 %v6231_v4  ;;  %6001 = vmatprep.subr.bf16.mxu1 %v6231_v4 }
 0x4b0   :  { %5671 = vmatprep.mubr.msk.f32.mxu0 %vm6232_vm1, %v6233_v5  ;;  %5684 = vmatprep.mubr.msk.f32.mxu1 %vm6232_vm1, %v6233_v5 }
 0x4b2   :  { %5997 = vmatpush3.bf16.msra.mxu0 %v5996_v7  ;;  %6003 = vmatpush3.bf16.msra.mxu1 %v6002_v12 }
 0x4b3   :  { %5669 = vmatprep.subr.mxu0 %v6233_v5  ;;  %5682 = vmatprep.subr.mxu1 %v6233_v5 }
 0x4b6   :  { %5670 = vmatpush3.msk.msra.mxu0 %vm45_vm2, %v3786_v22  ;;  %5683 = vmatpush3.msk.msra.mxu1 %vm45_vm2, %v3869_v31  ;;  %v4576_v22 = vld [vmem:[%s7673_s3 + $0x22] ss:$0 sm:$0xff]  ;;  %s6206_s3 = scalar_lea.vmem %s4387_s22, 32 }
 0x4b7   :  { %5672 = vmatmul.mubr.msk.f32.vlgmr.msra.gmra.mrb[30].mxu0 %vm35_vm0, %v3781_v51  ;;  %5685 = vmatmul.mubr.msk.f32.vlgmr.msra.gmra.mrb[34].mxu1 %vm35_vm0, %v3864_v52  ;;  %p6207_p0 = scmp.ne.s32.totalorder %s4387_s22, %s6206_s3  ;;  %p6212_p2 = scmp.lt.s32.totalorder %s6206_s3, %s6206_s3 }
 0x4b8   :  { %6004 = vmatprep.subr.bf16.mxu0 %v6231_v4  ;;  %6010 = vmatprep.subr.bf16.mxu1 %v6231_v4 }
 0x4b9   :  { %6006 = vmatpush3.bf16.msra.mxu0 %v6005_v35  ;;  %6012 = vmatpush3.bf16.msra.mxu1 %v6011_v36  ;;  %p6213_p3 = por %p6212_p2, %p6211_p1 }
 0x4ba   :  { %6007 = vmatprep.subr.bf16.mxu0 %v6231_v4  ;;  %6013 = vmatprep.subr.bf16.mxu1 %v6231_v4 }
 0x4bb   :  { %5697 = vmatprep.mubr.msk.f32.mxu0 %vm6232_vm1, %v6233_v5  ;;  %5710 = vmatprep.mubr.msk.f32.mxu1 %vm6232_vm1, %v6233_v5  ;;  %p6214_p4 = pnand %p6213_p3, %p6207_p0 }
 0x4bd   :  { %6009 = vmatpush3.bf16.msra.mxu0 %v6008_v13  ;;  %6015 = vmatpush3.bf16.msra.mxu1 %v6014_v59 }
 0x4be   :  { %5695 = vmatprep.subr.mxu0 %v6233_v5  ;;  %5708 = vmatprep.subr.mxu1 %v6233_v5 }
 0x4c1   :  { %5696 = vmatpush3.msk.msra.mxu0 %vm45_vm2, %v3952_v6  ;;  %5709 = vmatpush3.msk.msra.mxu1 %vm45_vm2, %v4035_v9 }
 0x4c2   :  { %5698 = vmatmul.mubr.msk.f32.vlgmr.msra.gmra.mrb[32].mxu0 %vm35_vm0, %v3947_v25  ;;  %5711 = vmatmul.mubr.msk.f32.vlgmr.msra.gmra.mrb[36].mxu1 %vm35_vm0, %v4030_v27 }
 0x4c3   :  { %6016 = vmatprep.subr.bf16.mxu0 %v6231_v4  ;;  %6022 = vmatprep.subr.bf16.mxu1 %v6231_v4 }
 0x4c4   :  { %6018 = vmatpush3.bf16.msra.mxu0 %v6017_v56  ;;  %6024 = vmatpush3.bf16.msra.mxu1 %v6023_v11 }
 0x4c5   :  { %6019 = vmatprep.subr.bf16.mxu0 %v6231_v4  ;;  %6025 = vmatprep.subr.bf16.mxu1 %v6231_v4 }
 0x4c6   :  { %5723 = vmatprep.mubr.msk.f32.mxu0 %vm6232_vm1, %v6233_v5  ;;  %5736 = vmatprep.mubr.msk.f32.mxu1 %vm6232_vm1, %v6233_v5 }
 0x4c8   :  { %6021 = vmatpush3.bf16.msra.mxu0 %v6020_v10  ;;  %6027 = vmatpush3.bf16.msra.mxu1 %v6026_v14 }
 0x4c9   :  { %5721 = vmatprep.subr.mxu0 %v6233_v5  ;;  %5734 = vmatprep.subr.mxu1 %v6233_v5 }
 0x4cc   :  { %5722 = vmatpush3.msk.msra.mxu0 %vm45_vm2, %v4118_v19  ;;  %5735 = vmatpush3.msk.msra.mxu1 %vm45_vm2, %v4201_v24 }
 0x4cd   :  { %5724 = vmatmul.mubr.msk.f32.vlgmr.msra.gmra.mrb[34].mxu0 %vm35_vm0, %v4113_v32  ;;  %5737 = vmatmul.mubr.msk.f32.vlgmr.msra.gmra.mrb[38].mxu1 %vm35_vm0, %v4196_v34 }
 0x4ce   :  { %6028 = vmatprep.subr.bf16.mxu0 %v6231_v4  ;;  %5749 = vmatprep.mubr.msk.f32.mxu0 %vm6232_vm1, %v6233_v5 }
 0x4cf   :  { %6030 = vmatpush3.bf16.msra.mxu0 %v6029_v26 }
 0x4d0   :  { %6031 = vmatprep.subr.bf16.mxu0 %v6231_v4 }
 0x4d3   :  { %6033 = vmatpush3.bf16.msra.mxu0 %v6032_v39 }
 0x4d4   :  { %5747 = vmatprep.subr.mxu0 %v6233_v5 }
 0x4d7   :  { %5748 = vmatpush3.msk.msra.mxu0 %vm45_vm2, %v4284_v60 }
 0x4d8   :  { %5750 = vmatmul.mubr.msk.f32.vlgmr.msra.gmra.mrb[36].mxu0 %vm35_vm0, %v4279_v1 }
 0x580   :  { %v3701_v40 = vpop.f32.mrb[28].mxu0  ;;  %v3777_v42 = vpop.f32.mrb[32].mxu1 }
 0x581   :  { %v3778_v33 = vadd.f32 %v3777_v42, %v3701_v40  ;;  %v5647_v38 = vpop.f32.mrb[29].mxu0  ;;  %v5660_v45 = vpop.f32.mrb[33].mxu1 }
 0x58a   :  { %v3859_v41 = vpop.f32.mrb[30].mxu0  ;;  %v3942_v43 = vpop.f32.mrb[34].mxu1 }
 0x58b   :  { %v3863_v4 = vadd.f32 %v3859_v41, %v3778_v33  ;;  %v5673_v44 = vpop.f32.mrb[31].mxu0  ;;  %v5686_v49 = vpop.f32.mrb[35].mxu1 }
 0x58d   :  { %v3946_v5 = vadd.f32 %v3942_v43, %v3863_v4 }
 0x595   :  { %v4025_v53 = vpop.f32.mrb[32].mxu0  ;;  %v4108_v20 = vpop.f32.mrb[36].mxu1 }
 0x596   :  { %v4029_v29 = vadd.f32 %v4025_v53, %v3946_v5  ;;  %v5699_v57 = vpop.f32.mrb[33].mxu0  ;;  %v5712_v58 = vpop.f32.mrb[37].mxu1 }
 0x598   :  { %v4112_v61 = vadd.f32 %v4108_v20, %v4029_v29 }
 0x5a0   :  { %v4191_v62 = vpop.f32.mrb[34].mxu0  ;;  %v4274_v7 = vpop.f32.mrb[38].mxu1 }
 0x5a1   :  { %v4195_v12 = vadd.f32 %v4191_v62, %v4112_v61  ;;  %v5725_v2 = vpop.f32.mrb[35].mxu0  ;;  %v5738_v8 = vpop.f32.mrb[39].mxu1 }
 0x5a3   :  { %v4278_v16 = vadd.f32 %v4274_v7, %v4195_v12 }
 0x5ab   :  { %v4357_v17 = vpop.f32.mrb[36].mxu0 }
 0x5ac   :  { %v4361_v31 = vadd.f32 %v4357_v17, %v4278_v16  ;;  %v5751_v35 = vpop.f32.mrb[37].mxu0 }
 0x5ae   :  { %v4366_v36 = vadd.f32 %v4576_v22, %v4361_v31 }
 0x5b0   :  { %v4368_v47 = vsel %vm4367_vm8, %v4366_v36, -inf }
 0x5b1   :  { %4369 = vmax.xlane.f32.xlu0 %v4368_v47 }
 0x63e   :  { %v4370_v48 = vpop.xlane.xlu0 %4369 }
 0x63f   :  { %v4371_v50 = vsub.f32 %v4366_v36, %v4370_v48 }
 0x641   :  { %v4372_v51 = vmul.f32 1.442695, %v4371_v50 }
 0x643   :  { %6202 = vpow2.f32 %v4372_v51 }
 0x64d   :  { %v6203_v52 = vpop.eup %6202 }
 0x64e   :  { %v4374_v55 = vsel %vm4367_vm8, %v6203_v52, 0.0 }
 0x64f   :  { %4375 = vadd.xlane.f32.xlu1 %v4374_v55 }
 0x6dc   :  { %v4376_v13 = vpop.xlane.xlu1 %4375 }
 0x6dd   :  { %6204 = vrcp.f32 %v4376_v13 }
 0x6e7   :  { %v6205_v59 = vpop.eup %6204 }
 0x6e8   :  { %v4378_v54 = vmul.f32 %v6205_v59, %v6203_v52 }
 0x6ea   :  { %4379 = vst.msk [vmem:[#allocation3] sm:$0x3] %vm4367_vm8, %v4378_v54 }
 0x6eb   :  { %6217 = shalt.err (!%p6214_p4)
}
 0x6ec   :  { %s6218_s25 = scalar_lea.hbm %s7674_s4, 32 }
 0x6ed   :  { %p6219_p5 = scmp.ne.s32.totalorder %s7674_s4, %s6218_s25  ;;  %p6222_p6 = scmp.lt.u32.totalorder %s6218_s25, %s7674_s4 }
 0x6ef   :  { %p6224_p7 = pnand %p6222_p6, %p6219_p5 }
 0x6f1   :  { %6227 = shalt.err (!%p6224_p7)
}
 0x6f2   :  { %4389 = dma.vmem_to_hbm [thread:$0]  %s4387_s22, 32, %s7674_s4, [#allocation4]  }
 0x6f3   :  { %6228 = dma.done.wait [#allocation4], 32  }
 0x6f4   :  { %6229 = vsyncadd [#allocation4], 4294967264 }
 0x6f5   :  { %4393 = vsyncpa [#allocation4], 1 }

</bundles_post_ra>
